<compile_context>
chip_gen: v6e
topology: v6e:2x2x1
jax: 0.10.0
libtpu: 0.0.40
codegen_flags: <defaults>
</compile_context>

<pallas_src>
import functools

import jax
import jax.numpy as jnp
from jax.experimental import pallas as pl
from jax.experimental.pallas import tpu as pltpu


def _round_up(x, m):
    return (x + m - 1) // m * m


def _p6p7_kernel(x_ref, w6_ref, b6_ref, w7_ref, b7_ref, p6_ref, p7_ref, pad7_ref,
                 *, ho6, wo6, ho7, wo7, cin_p, cout_p):
    """Fused P6 + P7 3x3/stride-2 convs for one batch element.

    x_ref:    (Ho6+1, Wo6+1, 4*Cin) bf16  space-to-depth packed, zero-padded x
              (last dim ordered: row-parity, col-parity, channel)
    w6_ref:   (9, Cin, Cout)  bf16        per-tap (kh*3+kw) weight slabs
    b6_ref:   (1, Cout)       f32
    w7_ref:   (9, Cout, Cout) bf16
    b7_ref:   (1, Cout)       f32
    p6_ref:   (M6, Cout)      f32         M6 = Ho6*Wo6
    p7_ref:   (M7, Cout)      f32         M7 = Ho7*Wo7
    pad7_ref: (2*(Ho7+1), 2*(Wo7+1), Cout) f32 VMEM scratch (padded relu(p6))
    """
    m6 = ho6 * wo6
    m7 = ho7 * wo7

    # -------- p6 = conv3x3/s2(x): 9 accumulating MXU matmuls, K = Cin -------
    # Stride-2 tap (kh, kw) of the padded input is a *contiguous* slice of the
    # space-to-depth block: rows rs:rs+Ho6, cols cs:cs+Wo6, one 128-aligned
    # channel group selected by the (row, col) parity of the tap.
    acc6 = jnp.broadcast_to(b6_ref[...], (m6, cout_p))
    for kh in range(3):
        rs = 1 if kh == 2 else 0
        for kw in range(3):
            cs = 1 if kw == 2 else 0
            par = (kh % 2) * 2 + (kw % 2)
            lhs = x_ref[rs:rs + ho6, cs:cs + wo6,
                        par * cin_p:(par + 1) * cin_p].reshape(m6, cin_p)
            acc6 = acc6 + jnp.dot(lhs, w6_ref[kh * 3 + kw],
                                  preferred_element_type=jnp.float32)
    p6_ref[...] = acc6

    # -------- p7 = conv3x3/s2(relu(p6)), fused, no HBM round-trip -----------
    # relu(p6) is slice-stored once into a zeroed padded VMEM scratch (no
    # concatenates); taps come from its even/odd deinterleaved view and feed 9
    # accumulating K=Cout matmuls (no (M7, 9*Cout) patch materialization).
    pad7_ref[...] = jnp.zeros_like(pad7_ref)
    pad7_ref[1:1 + ho6, 1:1 + wo6, :] = (
        jnp.maximum(acc6, 0.0).reshape(ho6, wo6, cout_p))
    p6pad = pad7_ref[...].reshape(ho7 + 1, 2, wo7 + 1, 2, cout_p)

    acc7 = jnp.broadcast_to(b7_ref[...], (m7, cout_p))
    for kh in range(3):
        rs = 1 if kh == 2 else 0
        for kw in range(3):
            cs = 1 if kw == 2 else 0
            lhs = p6pad[rs:rs + ho7, kh % 2, cs:cs + wo7, kw % 2, :]
            lhs = lhs.reshape(m7, cout_p).astype(jnp.bfloat16)
            acc7 = acc7 + jnp.dot(lhs, w7_ref[kh * 3 + kw],
                                  preferred_element_type=jnp.float32)
    p7_ref[...] = acc7


def last_level_p6p7_fwd(x_nchw, w6, b6, w7, b7):
    """Fused P6/P7 forward. x_nchw: (N, Cin, H, W) -> (p6, p7) in NCHW, f32."""
    n, cin, h, w = x_nchw.shape
    cout = w6.shape[0]
    ho6, wo6 = (h + 1) // 2, (w + 1) // 2
    ho7, wo7 = (ho6 + 1) // 2, (wo6 + 1) // 2
    m6, m7 = ho6 * wo6, ho7 * wo7

    # Lane-dense channel padding (no-op at production Cin=2048 / Cout=256).
    cin_p = _round_up(cin, 128)
    cout_p = _round_up(cout, 128)

    # Even spatial extents (pad 1 on top/left, >=1 on bottom/right) so stride-2
    # taps deinterleave cleanly; extra zero rows/cols are never read.
    hp6, wp6 = 2 * (ho6 + 1), 2 * (wo6 + 1)
    hp7, wp7 = 2 * (ho7 + 1), 2 * (wo7 + 1)

    # NCHW -> NHWC once, zero-pad (spatial + channels), bf16 for DMA + MXU,
    # then space-to-depth pack: (N, Ho6+1, Wo6+1, 4*Cin), last dim ordered
    # (row-parity, col-parity, channel).  Same bytes as the padded raw input —
    # no 9x im2col inflation in HBM.
    x_nhwc = jnp.transpose(x_nchw, (0, 2, 3, 1)).astype(jnp.bfloat16)
    x_pad = jnp.pad(x_nhwc, ((0, 0), (1, hp6 - 1 - h),
                             (1, wp6 - 1 - w), (0, cin_p - cin)))
    x_s2d = x_pad.reshape(n, ho6 + 1, 2, wo6 + 1, 2, cin_p)
    x_s2d = jnp.transpose(x_s2d, (0, 1, 3, 2, 4, 5))
    x_s2d = x_s2d.reshape(n, ho6 + 1, wo6 + 1, 4 * cin_p)

    # Per-tap weight slabs: OIHW -> (kh, kw, Cin, Cout), zero-padded channels.
    w6_slab = jnp.transpose(w6, (2, 3, 1, 0))
    w6_slab = jnp.pad(w6_slab, ((0, 0), (0, 0), (0, cin_p - cin), (0, cout_p - cout)))
    w6_slab = w6_slab.reshape(9, cin_p, cout_p).astype(jnp.bfloat16)
    w7_slab = jnp.transpose(w7, (2, 3, 1, 0))
    w7_slab = jnp.pad(w7_slab, ((0, 0), (0, 0), (0, cout_p - cout), (0, cout_p - cout)))
    w7_slab = w7_slab.reshape(9, cout_p, cout_p).astype(jnp.bfloat16)
    b6_row = jnp.pad(b6, (0, cout_p - cout)).reshape(1, cout_p).astype(jnp.float32)
    b7_row = jnp.pad(b7, (0, cout_p - cout)).reshape(1, cout_p).astype(jnp.float32)

    kernel = functools.partial(_p6p7_kernel, ho6=ho6, wo6=wo6, ho7=ho7, wo7=wo7,
                               cin_p=cin_p, cout_p=cout_p)

    # Weights / biases never change across the batch grid -> single-buffered.
    const = dict(pipeline_mode=pl.Buffered(1))

    p6_flat, p7_flat = pl.pallas_call(
        kernel,
        out_shape=[jax.ShapeDtypeStruct((n, m6, cout_p), jnp.float32),
                   jax.ShapeDtypeStruct((n, m7, cout_p), jnp.float32)],
        grid=(n,),
        in_specs=[
            pl.BlockSpec((None, ho6 + 1, wo6 + 1, 4 * cin_p),
                         lambda i: (i, 0, 0, 0)),
            pl.BlockSpec((9, cin_p, cout_p), lambda i: (0, 0, 0), **const),
            pl.BlockSpec((1, cout_p), lambda i: (0, 0), **const),
            pl.BlockSpec((9, cout_p, cout_p), lambda i: (0, 0, 0), **const),
            pl.BlockSpec((1, cout_p), lambda i: (0, 0), **const),
        ],
        out_specs=[pl.BlockSpec((None, m6, cout_p), lambda i: (i, 0, 0)),
                   pl.BlockSpec((None, m7, cout_p), lambda i: (i, 0, 0))],
        scratch_shapes=[pltpu.VMEM((hp7, wp7, cout_p), jnp.float32)],
        compiler_params=pltpu.CompilerParams(
            dimension_semantics=("parallel",),
            vmem_limit_bytes=48 * 1024 * 1024),
    )(x_s2d, w6_slab, b6_row, w7_slab, b7_row)

    # Only the final returned tensors go back to NCHW (PyTorch convention);
    # padded output channels (if any) are dropped here.
    p6 = jnp.transpose(p6_flat[:, :, :cout].reshape(n, ho6, wo6, cout), (0, 3, 1, 2))
    p7 = jnp.transpose(p7_flat[:, :, :cout].reshape(n, ho7, wo7, cout), (0, 3, 1, 2))
    return p6, p7


class LastLevelP6P7:
    """JAX/Pallas port of torchvision-style LastLevelP6P7."""

    def __init__(self, in_channels, out_channels, key):
        k6, k7 = jax.random.split(key)
        # kaiming_uniform_(a=1): bound = sqrt(6/((1+a^2)*fan_in)) = sqrt(3/fan_in)
        fan_in6 = in_channels * 9
        bound6 = (3.0 / fan_in6) ** 0.5
        self.w6 = jax.random.uniform(
            k6, (out_channels, in_channels, 3, 3), jnp.float32, -bound6, bound6)
        self.b6 = jnp.zeros((out_channels,), jnp.float32)

        fan_in7 = out_channels * 9
        bound7 = (3.0 / fan_in7) ** 0.5
        self.w7 = jax.random.uniform(
            k7, (out_channels, out_channels, 3, 3), jnp.float32, -bound7, bound7)
        self.b7 = jnp.zeros((out_channels,), jnp.float32)

        self.use_P5 = in_channels == out_channels

    def __call__(self, p, c, names):
        p5, c5 = p[-1], c[-1]
        x = p5 if self.use_P5 else c5
        p6, p7 = last_level_p6p7_fwd(x, self.w6, self.b6, self.w7, self.b7)
        return list(p) + [p6, p7], list(names) + ["p6", "p7"]


def _conv_ref(x, w, b, relu_input=False):
    """Pure-JAX reference (lax conv) with the same bf16 operand rounding."""
    xi = jnp.maximum(x, 0.0) if relu_input else x
    xi = xi.astype(jnp.bfloat16).astype(jnp.float32)
    wf = w.astype(jnp.bfloat16).astype(jnp.float32)
    y = jax.lax.conv_general_dilated(
        xi, wf, window_strides=(2, 2), padding=((1, 1), (1, 1)),
        dimension_numbers=("NCHW", "OIHW", "NCHW"))
    return y + b[None, :, None, None]


if __name__ == "__main__":
    key = jax.random.PRNGKey(0)
    k_c5, k_p5, k_mod = jax.random.split(key, 3)

    batch, in_channels, out_channels, spatial = 2, 4, 8, 16

    # c5: raw backbone feature map (in_channels); p5: FPN result (out_channels)
    c5 = jax.random.normal(k_c5, (batch, in_channels, spatial, spatial), jnp.float32)
    p5 = jax.random.normal(k_p5, (batch, out_channels, spatial, spatial), jnp.float32)

    block = LastLevelP6P7(in_channels, out_channels, k_mod)

    p_list, names = block([p5], [c5], ["p5"])
    p6, p7 = p_list[-2], p_list[-1]
    jax.block_until_ready(p7)

    assert names == ["p5", "p6", "p7"]
    assert p6.shape == (batch, out_channels, spatial // 2, spatial // 2)
    assert p7.shape == (batch, out_channels, spatial // 4, spatial // 4)

    # Correctness check (use_P5 is False here -> x = c5). bf16 MXU operands
    # (and bf16-rounded relu(p6) feeding p7) => loosened tolerance vs. a pure
    # f32 reference.
    p6_ref = _conv_ref(c5, block.w6, block.b6, relu_input=False)
    p7_ref = _conv_ref(p6_ref, block.w7, block.b7, relu_input=True)
    assert jnp.allclose(p6, p6_ref, atol=2e-2, rtol=2e-2)
    assert jnp.allclose(p7, p7_ref, atol=2e-2, rtol=2e-2)

    print("KERNEL_OK")
</pallas_src>

<mosaic_0001>
module attributes {stable_mosaic.version = 11 : i64} {
  func.func @_p6p7_kernel(%arg0: i32, %arg1: memref<1x9x9x512xbf16, #tpu.memory_space<vmem>>, %arg2: memref<9x128x128xbf16, #tpu.memory_space<vmem>>, %arg3: memref<1x128xf32, #tpu.memory_space<vmem>>, %arg4: memref<9x128x128xbf16, #tpu.memory_space<vmem>>, %arg5: memref<1x128xf32, #tpu.memory_space<vmem>>, %arg6: memref<1x64x128xf32, #tpu.memory_space<vmem>>, %arg7: memref<1x16x128xf32, #tpu.memory_space<vmem>>, %arg8: memref<10x10x128xf32, #tpu.memory_space<vmem>>) attributes {dimension_semantics = [#tpu.dimension_semantics<parallel>], iteration_bounds = array<i64: 2>, scalar_prefetch = 0 : i64, scratch_operands = 1 : i64, tpu.core_type = #tpu.core_type<tc>, window_params = [{transform_indices = @transform_0, window_bounds = array<i64: 1, 9, 9, 512>}, {pipeline_mode = #tpu.pipeline_mode<synchronous>, transform_indices = @transform_1, window_bounds = array<i64: 9, 128, 128>}, {pipeline_mode = #tpu.pipeline_mode<synchronous>, transform_indices = @transform_2, window_bounds = array<i64: 1, 128>}, {pipeline_mode = #tpu.pipeline_mode<synchronous>, transform_indices = @transform_3, window_bounds = array<i64: 9, 128, 128>}, {pipeline_mode = #tpu.pipeline_mode<synchronous>, transform_indices = @transform_4, window_bounds = array<i64: 1, 128>}, {transform_indices = @transform_5, window_bounds = array<i64: 1, 64, 128>}, {transform_indices = @transform_6, window_bounds = array<i64: 1, 16, 128>}]} {
    %c0 = arith.constant 0 : index
    %c0_0 = arith.constant 0 : index
    %0 = vector.load %arg3[%c0, %c0_0] : memref<1x128xf32, #tpu.memory_space<vmem>>, vector<1x128xf32>
    %1 = vector.shape_cast %0 : vector<1x128xf32> to vector<1x128xf32>
    %2 = vector.broadcast %1 : vector<1x128xf32> to vector<64x128xf32>
    %c0_1 = arith.constant 0 : index
    %c0_2 = arith.constant 0 : index
    %c0_3 = arith.constant 0 : index
    %c0_4 = arith.constant 0 : index
    %3 = vector.load %arg1[%c0_1, %c0_2, %c0_3, %c0_4] : memref<1x9x9x512xbf16, #tpu.memory_space<vmem>>, vector<1x8x8x128xbf16>
    %4 = vector.shape_cast %3 : vector<1x8x8x128xbf16> to vector<8x8x128xbf16>
    %5 = vector.shape_cast %4 : vector<8x8x128xbf16> to vector<64x128xbf16>
    %c0_5 = arith.constant 0 : index
    %c0_6 = arith.constant 0 : index
    %c0_7 = arith.constant 0 : index
    %6 = vector.load %arg2[%c0_5, %c0_6, %c0_7] : memref<9x128x128xbf16, #tpu.memory_space<vmem>>, vector<1x128x128xbf16>
    %7 = vector.shape_cast %6 : vector<1x128x128xbf16> to vector<128x128xbf16>
    %cst = arith.constant dense<0.000000e+00> : vector<64x128xf32>
    %8 = tpu.matmul %5, %7, %cst {dimension_numbers = #tpu.dot_dimension_numbers<[1], [0], [0], [1], [0, 0, 1, 1], [], []>} : vector<64x128xbf16>, vector<128x128xbf16>, vector<64x128xf32> -> vector<64x128xf32>
    %9 = arith.addf %2, %8 : vector<64x128xf32>
    %c0_8 = arith.constant 0 : index
    %c0_9 = arith.constant 0 : index
    %c0_10 = arith.constant 0 : index
    %c128 = arith.constant 128 : index
    %10 = vector.load %arg1[%c0_8, %c0_9, %c0_10, %c128] : memref<1x9x9x512xbf16, #tpu.memory_space<vmem>>, vector<1x8x8x128xbf16>
    %11 = vector.shape_cast %10 : vector<1x8x8x128xbf16> to vector<8x8x128xbf16>
    %12 = vector.shape_cast %11 : vector<8x8x128xbf16> to vector<64x128xbf16>
    %c1 = arith.constant 1 : index
    %c0_11 = arith.constant 0 : index
    %c0_12 = arith.constant 0 : index
    %13 = vector.load %arg2[%c1, %c0_11, %c0_12] : memref<9x128x128xbf16, #tpu.memory_space<vmem>>, vector<1x128x128xbf16>
    %14 = vector.shape_cast %13 : vector<1x128x128xbf16> to vector<128x128xbf16>
    %cst_13 = arith.constant dense<0.000000e+00> : vector<64x128xf32>
    %15 = tpu.matmul %12, %14, %cst_13 {dimension_numbers = #tpu.dot_dimension_numbers<[1], [0], [0], [1], [0, 0, 1, 1], [], []>} : vector<64x128xbf16>, vector<128x128xbf16>, vector<64x128xf32> -> vector<64x128xf32>
    %16 = arith.addf %9, %15 : vector<64x128xf32>
    %c0_14 = arith.constant 0 : index
    %c0_15 = arith.constant 0 : index
    %c1_16 = arith.constant 1 : index
    %c0_17 = arith.constant 0 : index
    %17 = vector.load %arg1[%c0_14, %c0_15, %c1_16, %c0_17] : memref<1x9x9x512xbf16, #tpu.memory_space<vmem>>, vector<1x8x8x128xbf16>
    %18 = vector.shape_cast %17 : vector<1x8x8x128xbf16> to vector<8x8x128xbf16>
    %19 = vector.shape_cast %18 : vector<8x8x128xbf16> to vector<64x128xbf16>
    %c2 = arith.constant 2 : index
    %c0_18 = arith.constant 0 : index
    %c0_19 = arith.constant 0 : index
    %20 = vector.load %arg2[%c2, %c0_18, %c0_19] : memref<9x128x128xbf16, #tpu.memory_space<vmem>>, vector<1x128x128xbf16>
    %21 = vector.shape_cast %20 : vector<1x128x128xbf16> to vector<128x128xbf16>
    %cst_20 = arith.constant dense<0.000000e+00> : vector<64x128xf32>
    %22 = tpu.matmul %19, %21, %cst_20 {dimension_numbers = #tpu.dot_dimension_numbers<[1], [0], [0], [1], [0, 0, 1, 1], [], []>} : vector<64x128xbf16>, vector<128x128xbf16>, vector<64x128xf32> -> vector<64x128xf32>
    %23 = arith.addf %16, %22 : vector<64x128xf32>
    %c0_21 = arith.constant 0 : index
    %c0_22 = arith.constant 0 : index
    %c0_23 = arith.constant 0 : index
    %c256 = arith.constant 256 : index
    %24 = vector.load %arg1[%c0_21, %c0_22, %c0_23, %c256] : memref<1x9x9x512xbf16, #tpu.memory_space<vmem>>, vector<1x8x8x128xbf16>
    %25 = vector.shape_cast %24 : vector<1x8x8x128xbf16> to vector<8x8x128xbf16>
    %26 = vector.shape_cast %25 : vector<8x8x128xbf16> to vector<64x128xbf16>
    %c3 = arith.constant 3 : index
    %c0_24 = arith.constant 0 : index
    %c0_25 = arith.constant 0 : index
    %27 = vector.load %arg2[%c3, %c0_24, %c0_25] : memref<9x128x128xbf16, #tpu.memory_space<vmem>>, vector<1x128x128xbf16>
    %28 = vector.shape_cast %27 : vector<1x128x128xbf16> to vector<128x128xbf16>
    %cst_26 = arith.constant dense<0.000000e+00> : vector<64x128xf32>
    %29 = tpu.matmul %26, %28, %cst_26 {dimension_numbers = #tpu.dot_dimension_numbers<[1], [0], [0], [1], [0, 0, 1, 1], [], []>} : vector<64x128xbf16>, vector<128x128xbf16>, vector<64x128xf32> -> vector<64x128xf32>
    %30 = arith.addf %23, %29 : vector<64x128xf32>
    %c0_27 = arith.constant 0 : index
    %c0_28 = arith.constant 0 : index
    %c0_29 = arith.constant 0 : index
    %c384 = arith.constant 384 : index
    %31 = vector.load %arg1[%c0_27, %c0_28, %c0_29, %c384] : memref<1x9x9x512xbf16, #tpu.memory_space<vmem>>, vector<1x8x8x128xbf16>
    %32 = vector.shape_cast %31 : vector<1x8x8x128xbf16> to vector<8x8x128xbf16>
    %33 = vector.shape_cast %32 : vector<8x8x128xbf16> to vector<64x128xbf16>
    %c4 = arith.constant 4 : index
    %c0_30 = arith.constant 0 : index
    %c0_31 = arith.constant 0 : index
    %34 = vector.load %arg2[%c4, %c0_30, %c0_31] : memref<9x128x128xbf16, #tpu.memory_space<vmem>>, vector<1x128x128xbf16>
    %35 = vector.shape_cast %34 : vector<1x128x128xbf16> to vector<128x128xbf16>
    %cst_32 = arith.constant dense<0.000000e+00> : vector<64x128xf32>
    %36 = tpu.matmul %33, %35, %cst_32 {dimension_numbers = #tpu.dot_dimension_numbers<[1], [0], [0], [1], [0, 0, 1, 1], [], []>} : vector<64x128xbf16>, vector<128x128xbf16>, vector<64x128xf32> -> vector<64x128xf32>
    %37 = arith.addf %30, %36 : vector<64x128xf32>
    %c0_33 = arith.constant 0 : index
    %c0_34 = arith.constant 0 : index
    %c1_35 = arith.constant 1 : index
    %c256_36 = arith.constant 256 : index
    %38 = vector.load %arg1[%c0_33, %c0_34, %c1_35, %c256_36] : memref<1x9x9x512xbf16, #tpu.memory_space<vmem>>, vector<1x8x8x128xbf16>
    %39 = vector.shape_cast %38 : vector<1x8x8x128xbf16> to vector<8x8x128xbf16>
    %40 = vector.shape_cast %39 : vector<8x8x128xbf16> to vector<64x128xbf16>
    %c5 = arith.constant 5 : index
    %c0_37 = arith.constant 0 : index
    %c0_38 = arith.constant 0 : index
    %41 = vector.load %arg2[%c5, %c0_37, %c0_38] : memref<9x128x128xbf16, #tpu.memory_space<vmem>>, vector<1x128x128xbf16>
    %42 = vector.shape_cast %41 : vector<1x128x128xbf16> to vector<128x128xbf16>
    %cst_39 = arith.constant dense<0.000000e+00> : vector<64x128xf32>
    %43 = tpu.matmul %40, %42, %cst_39 {dimension_numbers = #tpu.dot_dimension_numbers<[1], [0], [0], [1], [0, 0, 1, 1], [], []>} : vector<64x128xbf16>, vector<128x128xbf16>, vector<64x128xf32> -> vector<64x128xf32>
    %44 = arith.addf %37, %43 : vector<64x128xf32>
    %c0_40 = arith.constant 0 : index
    %c1_41 = arith.constant 1 : index
    %c0_42 = arith.constant 0 : index
    %c0_43 = arith.constant 0 : index
    %45 = vector.load %arg1[%c0_40, %c1_41, %c0_42, %c0_43] : memref<1x9x9x512xbf16, #tpu.memory_space<vmem>>, vector<1x8x8x128xbf16>
    %46 = vector.shape_cast %45 : vector<1x8x8x128xbf16> to vector<8x8x128xbf16>
    %47 = vector.shape_cast %46 : vector<8x8x128xbf16> to vector<64x128xbf16>
    %c6 = arith.constant 6 : index
    %c0_44 = arith.constant 0 : index
    %c0_45 = arith.constant 0 : index
    %48 = vector.load %arg2[%c6, %c0_44, %c0_45] : memref<9x128x128xbf16, #tpu.memory_space<vmem>>, vector<1x128x128xbf16>
    %49 = vector.shape_cast %48 : vector<1x128x128xbf16> to vector<128x128xbf16>
    %cst_46 = arith.constant dense<0.000000e+00> : vector<64x128xf32>
    %50 = tpu.matmul %47, %49, %cst_46 {dimension_numbers = #tpu.dot_dimension_numbers<[1], [0], [0], [1], [0, 0, 1, 1], [], []>} : vector<64x128xbf16>, vector<128x128xbf16>, vector<64x128xf32> -> vector<64x128xf32>
    %51 = arith.addf %44, %50 : vector<64x128xf32>
    %c0_47 = arith.constant 0 : index
    %c1_48 = arith.constant 1 : index
    %c0_49 = arith.constant 0 : index
    %c128_50 = arith.constant 128 : index
    %52 = vector.load %arg1[%c0_47, %c1_48, %c0_49, %c128_50] : memref<1x9x9x512xbf16, #tpu.memory_space<vmem>>, vector<1x8x8x128xbf16>
    %53 = vector.shape_cast %52 : vector<1x8x8x128xbf16> to vector<8x8x128xbf16>
    %54 = vector.shape_cast %53 : vector<8x8x128xbf16> to vector<64x128xbf16>
    %c7 = arith.constant 7 : index
    %c0_51 = arith.constant 0 : index
    %c0_52 = arith.constant 0 : index
    %55 = vector.load %arg2[%c7, %c0_51, %c0_52] : memref<9x128x128xbf16, #tpu.memory_space<vmem>>, vector<1x128x128xbf16>
    %56 = vector.shape_cast %55 : vector<1x128x128xbf16> to vector<128x128xbf16>
    %cst_53 = arith.constant dense<0.000000e+00> : vector<64x128xf32>
    %57 = tpu.matmul %54, %56, %cst_53 {dimension_numbers = #tpu.dot_dimension_numbers<[1], [0], [0], [1], [0, 0, 1, 1], [], []>} : vector<64x128xbf16>, vector<128x128xbf16>, vector<64x128xf32> -> vector<64x128xf32>
    %58 = arith.addf %51, %57 : vector<64x128xf32>
    %c0_54 = arith.constant 0 : index
    %c1_55 = arith.constant 1 : index
    %c1_56 = arith.constant 1 : index
    %c0_57 = arith.constant 0 : index
    %59 = vector.load %arg1[%c0_54, %c1_55, %c1_56, %c0_57] : memref<1x9x9x512xbf16, #tpu.memory_space<vmem>>, vector<1x8x8x128xbf16>
    %60 = vector.shape_cast %59 : vector<1x8x8x128xbf16> to vector<8x8x128xbf16>
    %61 = vector.shape_cast %60 : vector<8x8x128xbf16> to vector<64x128xbf16>
    %c8 = arith.constant 8 : index
    %c0_58 = arith.constant 0 : index
    %c0_59 = arith.constant 0 : index
    %62 = vector.load %arg2[%c8, %c0_58, %c0_59] : memref<9x128x128xbf16, #tpu.memory_space<vmem>>, vector<1x128x128xbf16>
    %63 = vector.shape_cast %62 : vector<1x128x128xbf16> to vector<128x128xbf16>
    %cst_60 = arith.constant dense<0.000000e+00> : vector<64x128xf32>
    %64 = tpu.matmul %61, %63, %cst_60 {dimension_numbers = #tpu.dot_dimension_numbers<[1], [0], [0], [1], [0, 0, 1, 1], [], []>} : vector<64x128xbf16>, vector<128x128xbf16>, vector<64x128xf32> -> vector<64x128xf32>
    %65 = arith.addf %58, %64 : vector<64x128xf32>
    %c0_61 = arith.constant 0 : index
    %c0_62 = arith.constant 0 : index
    %c0_63 = arith.constant 0 : index
    %66 = vector.load %arg6[%c0_61, %c0_62, %c0_63] : memref<1x64x128xf32, #tpu.memory_space<vmem>>, vector<1x64x128xf32>
    %67 = vector.shape_cast %66 : vector<1x64x128xf32> to vector<64x128xf32>
    %68 = vector.shape_cast %65 : vector<64x128xf32> to vector<1x64x128xf32>
    tpu.vector_store %arg6[%c0_61, %c0_62, %c0_63], %68 {strides = array<i32>} : memref<1x64x128xf32, #tpu.memory_space<vmem>>, vector<1x64x128xf32>,
    %cst_64 = arith.constant 0.000000e+00 : f32
    %69 = vector.broadcast %cst_64 : f32 to vector<10x10x128xf32>
    %c0_65 = arith.constant 0 : index
    %c0_66 = arith.constant 0 : index
    %c0_67 = arith.constant 0 : index
    %70 = vector.load %arg8[%c0_65, %c0_66, %c0_67] : memref<10x10x128xf32, #tpu.memory_space<vmem>>, vector<10x10x128xf32>
    tpu.vector_store %arg8[%c0_65, %c0_66, %c0_67], %69 {strides = array<i32>} : memref<10x10x128xf32, #tpu.memory_space<vmem>>, vector<10x10x128xf32>,
    %cst_68 = arith.constant 0.000000e+00 : f32
    %71 = vector.broadcast %cst_68 : f32 to vector<64x128xf32>
    %72 = arith.maximumf %65, %71 : vector<64x128xf32>
    %73 = vector.shape_cast %72 : vector<64x128xf32> to vector<8x8x128xf32>
    %c1_69 = arith.constant 1 : index
    %c1_70 = arith.constant 1 : index
    %c0_71 = arith.constant 0 : index
    %74 = vector.load %arg8[%c1_69, %c1_70, %c0_71] : memref<10x10x128xf32, #tpu.memory_space<vmem>>, vector<8x8x128xf32>
    tpu.vector_store %arg8[%c1_69, %c1_70, %c0_71], %73 {strides = array<i32>} : memref<10x10x128xf32, #tpu.memory_space<vmem>>, vector<8x8x128xf32>,
    %c0_72 = arith.constant 0 : index
    %c0_73 = arith.constant 0 : index
    %c0_74 = arith.constant 0 : index
    %75 = vector.load %arg8[%c0_72, %c0_73, %c0_74] : memref<10x10x128xf32, #tpu.memory_space<vmem>>, vector<10x10x128xf32>
    %76 = vector.shape_cast %75 : vector<10x10x128xf32> to vector<5x2x5x2x128xf32>
    %c0_75 = arith.constant 0 : index
    %c0_76 = arith.constant 0 : index
    %77 = vector.load %arg5[%c0_75, %c0_76] : memref<1x128xf32, #tpu.memory_space<vmem>>, vector<1x128xf32>
    %78 = vector.shape_cast %77 : vector<1x128xf32> to vector<1x128xf32>
    %79 = vector.broadcast %78 : vector<1x128xf32> to vector<16x128xf32>
    %80 = vector.extract_strided_slice %76 {offsets = [0, 0, 0, 0, 0], sizes = [4, 1, 4, 1, 128], strides = [1, 1, 1, 1, 1]} : vector<5x2x5x2x128xf32> to vector<4x1x4x1x128xf32>
    %81 = vector.shape_cast %80 : vector<4x1x4x1x128xf32> to vector<4x4x128xf32>
    %82 = vector.shape_cast %81 : vector<4x4x128xf32> to vector<16x128xf32>
    %83 = arith.truncf %82 : vector<16x128xf32> to vector<16x128xbf16>
    %c0_77 = arith.constant 0 : index
    %c0_78 = arith.constant 0 : index
    %c0_79 = arith.constant 0 : index
    %84 = vector.load %arg4[%c0_77, %c0_78, %c0_79] : memref<9x128x128xbf16, #tpu.memory_space<vmem>>, vector<1x128x128xbf16>
    %85 = vector.shape_cast %84 : vector<1x128x128xbf16> to vector<128x128xbf16>
    %cst_80 = arith.constant dense<0.000000e+00> : vector<16x128xf32>
    %86 = tpu.matmul %83, %85, %cst_80 {dimension_numbers = #tpu.dot_dimension_numbers<[1], [0], [0], [1], [0, 0, 1, 1], [], []>} : vector<16x128xbf16>, vector<128x128xbf16>, vector<16x128xf32> -> vector<16x128xf32>
    %87 = arith.addf %79, %86 : vector<16x128xf32>
    %88 = vector.extract_strided_slice %76 {offsets = [0, 0, 0, 1, 0], sizes = [4, 1, 4, 1, 128], strides = [1, 1, 1, 1, 1]} : vector<5x2x5x2x128xf32> to vector<4x1x4x1x128xf32>
    %89 = vector.shape_cast %88 : vector<4x1x4x1x128xf32> to vector<4x4x128xf32>
    %90 = vector.shape_cast %89 : vector<4x4x128xf32> to vector<16x128xf32>
    %91 = arith.truncf %90 : vector<16x128xf32> to vector<16x128xbf16>
    %c1_81 = arith.constant 1 : index
    %c0_82 = arith.constant 0 : index
    %c0_83 = arith.constant 0 : index
    %92 = vector.load %arg4[%c1_81, %c0_82, %c0_83] : memref<9x128x128xbf16, #tpu.memory_space<vmem>>, vector<1x128x128xbf16>
    %93 = vector.shape_cast %92 : vector<1x128x128xbf16> to vector<128x128xbf16>
    %cst_84 = arith.constant dense<0.000000e+00> : vector<16x128xf32>
    %94 = tpu.matmul %91, %93, %cst_84 {dimension_numbers = #tpu.dot_dimension_numbers<[1], [0], [0], [1], [0, 0, 1, 1], [], []>} : vector<16x128xbf16>, vector<128x128xbf16>, vector<16x128xf32> -> vector<16x128xf32>
    %95 = arith.addf %87, %94 : vector<16x128xf32>
    %96 = vector.extract_strided_slice %76 {offsets = [0, 0, 1, 0, 0], sizes = [4, 1, 4, 1, 128], strides = [1, 1, 1, 1, 1]} : vector<5x2x5x2x128xf32> to vector<4x1x4x1x128xf32>
    %97 = vector.shape_cast %96 : vector<4x1x4x1x128xf32> to vector<4x4x128xf32>
    %98 = vector.shape_cast %97 : vector<4x4x128xf32> to vector<16x128xf32>
    %99 = arith.truncf %98 : vector<16x128xf32> to vector<16x128xbf16>
    %c2_85 = arith.constant 2 : index
    %c0_86 = arith.constant 0 : index
    %c0_87 = arith.constant 0 : index
    %100 = vector.load %arg4[%c2_85, %c0_86, %c0_87] : memref<9x128x128xbf16, #tpu.memory_space<vmem>>, vector<1x128x128xbf16>
    %101 = vector.shape_cast %100 : vector<1x128x128xbf16> to vector<128x128xbf16>
    %cst_88 = arith.constant dense<0.000000e+00> : vector<16x128xf32>
    %102 = tpu.matmul %99, %101, %cst_88 {dimension_numbers = #tpu.dot_dimension_numbers<[1], [0], [0], [1], [0, 0, 1, 1], [], []>} : vector<16x128xbf16>, vector<128x128xbf16>, vector<16x128xf32> -> vector<16x128xf32>
    %103 = arith.addf %95, %102 : vector<16x128xf32>
    %104 = vector.extract_strided_slice %76 {offsets = [0, 1, 0, 0, 0], sizes = [4, 1, 4, 1, 128], strides = [1, 1, 1, 1, 1]} : vector<5x2x5x2x128xf32> to vector<4x1x4x1x128xf32>
    %105 = vector.shape_cast %104 : vector<4x1x4x1x128xf32> to vector<4x4x128xf32>
    %106 = vector.shape_cast %105 : vector<4x4x128xf32> to vector<16x128xf32>
    %107 = arith.truncf %106 : vector<16x128xf32> to vector<16x128xbf16>
    %c3_89 = arith.constant 3 : index
    %c0_90 = arith.constant 0 : index
    %c0_91 = arith.constant 0 : index
    %108 = vector.load %arg4[%c3_89, %c0_90, %c0_91] : memref<9x128x128xbf16, #tpu.memory_space<vmem>>, vector<1x128x128xbf16>
    %109 = vector.shape_cast %108 : vector<1x128x128xbf16> to vector<128x128xbf16>
    %cst_92 = arith.constant dense<0.000000e+00> : vector<16x128xf32>
    %110 = tpu.matmul %107, %109, %cst_92 {dimension_numbers = #tpu.dot_dimension_numbers<[1], [0], [0], [1], [0, 0, 1, 1], [], []>} : vector<16x128xbf16>, vector<128x128xbf16>, vector<16x128xf32> -> vector<16x128xf32>
    %111 = arith.addf %103, %110 : vector<16x128xf32>
    %112 = vector.extract_strided_slice %76 {offsets = [0, 1, 0, 1, 0], sizes = [4, 1, 4, 1, 128], strides = [1, 1, 1, 1, 1]} : vector<5x2x5x2x128xf32> to vector<4x1x4x1x128xf32>
    %113 = vector.shape_cast %112 : vector<4x1x4x1x128xf32> to vector<4x4x128xf32>
    %114 = vector.shape_cast %113 : vector<4x4x128xf32> to vector<16x128xf32>
    %115 = arith.truncf %114 : vector<16x128xf32> to vector<16x128xbf16>
    %c4_93 = arith.constant 4 : index
    %c0_94 = arith.constant 0 : index
    %c0_95 = arith.constant 0 : index
    %116 = vector.load %arg4[%c4_93, %c0_94, %c0_95] : memref<9x128x128xbf16, #tpu.memory_space<vmem>>, vector<1x128x128xbf16>
    %117 = vector.shape_cast %116 : vector<1x128x128xbf16> to vector<128x128xbf16>
    %cst_96 = arith.constant dense<0.000000e+00> : vector<16x128xf32>
    %118 = tpu.matmul %115, %117, %cst_96 {dimension_numbers = #tpu.dot_dimension_numbers<[1], [0], [0], [1], [0, 0, 1, 1], [], []>} : vector<16x128xbf16>, vector<128x128xbf16>, vector<16x128xf32> -> vector<16x128xf32>
    %119 = arith.addf %111, %118 : vector<16x128xf32>
    %120 = vector.extract_strided_slice %76 {offsets = [0, 1, 1, 0, 0], sizes = [4, 1, 4, 1, 128], strides = [1, 1, 1, 1, 1]} : vector<5x2x5x2x128xf32> to vector<4x1x4x1x128xf32>
    %121 = vector.shape_cast %120 : vector<4x1x4x1x128xf32> to vector<4x4x128xf32>
    %122 = vector.shape_cast %121 : vector<4x4x128xf32> to vector<16x128xf32>
    %123 = arith.truncf %122 : vector<16x128xf32> to vector<16x128xbf16>
    %c5_97 = arith.constant 5 : index
    %c0_98 = arith.constant 0 : index
    %c0_99 = arith.constant 0 : index
    %124 = vector.load %arg4[%c5_97, %c0_98, %c0_99] : memref<9x128x128xbf16, #tpu.memory_space<vmem>>, vector<1x128x128xbf16>
    %125 = vector.shape_cast %124 : vector<1x128x128xbf16> to vector<128x128xbf16>
    %cst_100 = arith.constant dense<0.000000e+00> : vector<16x128xf32>
    %126 = tpu.matmul %123, %125, %cst_100 {dimension_numbers = #tpu.dot_dimension_numbers<[1], [0], [0], [1], [0, 0, 1, 1], [], []>} : vector<16x128xbf16>, vector<128x128xbf16>, vector<16x128xf32> -> vector<16x128xf32>
    %127 = arith.addf %119, %126 : vector<16x128xf32>
    %128 = vector.extract_strided_slice %76 {offsets = [1, 0, 0, 0, 0], sizes = [4, 1, 4, 1, 128], strides = [1, 1, 1, 1, 1]} : vector<5x2x5x2x128xf32> to vector<4x1x4x1x128xf32>
    %129 = vector.shape_cast %128 : vector<4x1x4x1x128xf32> to vector<4x4x128xf32>
    %130 = vector.shape_cast %129 : vector<4x4x128xf32> to vector<16x128xf32>
    %131 = arith.truncf %130 : vector<16x128xf32> to vector<16x128xbf16>
    %c6_101 = arith.constant 6 : index
    %c0_102 = arith.constant 0 : index
    %c0_103 = arith.constant 0 : index
    %132 = vector.load %arg4[%c6_101, %c0_102, %c0_103] : memref<9x128x128xbf16, #tpu.memory_space<vmem>>, vector<1x128x128xbf16>
    %133 = vector.shape_cast %132 : vector<1x128x128xbf16> to vector<128x128xbf16>
    %cst_104 = arith.constant dense<0.000000e+00> : vector<16x128xf32>
    %134 = tpu.matmul %131, %133, %cst_104 {dimension_numbers = #tpu.dot_dimension_numbers<[1], [0], [0], [1], [0, 0, 1, 1], [], []>} : vector<16x128xbf16>, vector<128x128xbf16>, vector<16x128xf32> -> vector<16x128xf32>
    %135 = arith.addf %127, %134 : vector<16x128xf32>
    %136 = vector.extract_strided_slice %76 {offsets = [1, 0, 0, 1, 0], sizes = [4, 1, 4, 1, 128], strides = [1, 1, 1, 1, 1]} : vector<5x2x5x2x128xf32> to vector<4x1x4x1x128xf32>
    %137 = vector.shape_cast %136 : vector<4x1x4x1x128xf32> to vector<4x4x128xf32>
    %138 = vector.shape_cast %137 : vector<4x4x128xf32> to vector<16x128xf32>
    %139 = arith.truncf %138 : vector<16x128xf32> to vector<16x128xbf16>
    %c7_105 = arith.constant 7 : index
    %c0_106 = arith.constant 0 : index
    %c0_107 = arith.constant 0 : index
    %140 = vector.load %arg4[%c7_105, %c0_106, %c0_107] : memref<9x128x128xbf16, #tpu.memory_space<vmem>>, vector<1x128x128xbf16>
    %141 = vector.shape_cast %140 : vector<1x128x128xbf16> to vector<128x128xbf16>
    %cst_108 = arith.constant dense<0.000000e+00> : vector<16x128xf32>
    %142 = tpu.matmul %139, %141, %cst_108 {dimension_numbers = #tpu.dot_dimension_numbers<[1], [0], [0], [1], [0, 0, 1, 1], [], []>} : vector<16x128xbf16>, vector<128x128xbf16>, vector<16x128xf32> -> vector<16x128xf32>
    %143 = arith.addf %135, %142 : vector<16x128xf32>
    %144 = vector.extract_strided_slice %76 {offsets = [1, 0, 1, 0, 0], sizes = [4, 1, 4, 1, 128], strides = [1, 1, 1, 1, 1]} : vector<5x2x5x2x128xf32> to vector<4x1x4x1x128xf32>
    %145 = vector.shape_cast %144 : vector<4x1x4x1x128xf32> to vector<4x4x128xf32>
    %146 = vector.shape_cast %145 : vector<4x4x128xf32> to vector<16x128xf32>
    %147 = arith.truncf %146 : vector<16x128xf32> to vector<16x128xbf16>
    %c8_109 = arith.constant 8 : index
    %c0_110 = arith.constant 0 : index
    %c0_111 = arith.constant 0 : index
    %148 = vector.load %arg4[%c8_109, %c0_110, %c0_111] : memref<9x128x128xbf16, #tpu.memory_space<vmem>>, vector<1x128x128xbf16>
    %149 = vector.shape_cast %148 : vector<1x128x128xbf16> to vector<128x128xbf16>
    %cst_112 = arith.constant dense<0.000000e+00> : vector<16x128xf32>
    %150 = tpu.matmul %147, %149, %cst_112 {dimension_numbers = #tpu.dot_dimension_numbers<[1], [0], [0], [1], [0, 0, 1, 1], [], []>} : vector<16x128xbf16>, vector<128x128xbf16>, vector<16x128xf32> -> vector<16x128xf32>
    %151 = arith.addf %143, %150 : vector<16x128xf32>
    %c0_113 = arith.constant 0 : index
    %c0_114 = arith.constant 0 : index
    %c0_115 = arith.constant 0 : index
    %152 = vector.load %arg7[%c0_113, %c0_114, %c0_115] : memref<1x16x128xf32, #tpu.memory_space<vmem>>, vector<1x16x128xf32>
    %153 = vector.shape_cast %152 : vector<1x16x128xf32> to vector<16x128xf32>
    %154 = vector.shape_cast %151 : vector<16x128xf32> to vector<1x16x128xf32>
    tpu.vector_store %arg7[%c0_113, %c0_114, %c0_115], %154 {strides = array<i32>} : memref<1x16x128xf32, #tpu.memory_space<vmem>>, vector<1x16x128xf32>,
    return
  }
  func.func @transform_0(%arg0: i32) -> (i32, i32, i32, i32) {
    %c0_i32 = arith.constant 0 : i32
    %c0_i32_0 = arith.constant 0 : i32
    %c0_i32_1 = arith.constant 0 : i32
    %c0_i32_2 = arith.constant 0 : i32
    return %arg0, %c0_i32, %c0_i32_0, %c0_i32_1 : i32, i32, i32, i32
  }
  func.func @transform_1(%arg0: i32) -> (i32, i32, i32) {
    %c0_i32 = arith.constant 0 : i32
    %c0_i32_0 = arith.constant 0 : i32
    %c0_i32_1 = arith.constant 0 : i32
    %c0_i32_2 = arith.constant 0 : i32
    return %c0_i32, %c0_i32_0, %c0_i32_1 : i32, i32, i32
  }
  func.func @transform_2(%arg0: i32) -> (i32, i32) {
    %c0_i32 = arith.constant 0 : i32
    %c0_i32_0 = arith.constant 0 : i32
    %c0_i32_1 = arith.constant 0 : i32
    return %c0_i32, %c0_i32_0 : i32, i32
  }
  func.func @transform_3(%arg0: i32) -> (i32, i32, i32) {
    %c0_i32 = arith.constant 0 : i32
    %c0_i32_0 = arith.constant 0 : i32
    %c0_i32_1 = arith.constant 0 : i32
    %c0_i32_2 = arith.constant 0 : i32
    return %c0_i32, %c0_i32_0, %c0_i32_1 : i32, i32, i32
  }
  func.func @transform_4(%arg0: i32) -> (i32, i32) {
    %c0_i32 = arith.constant 0 : i32
    %c0_i32_0 = arith.constant 0 : i32
    %c0_i32_1 = arith.constant 0 : i32
    return %c0_i32, %c0_i32_0 : i32, i32
  }
  func.func @transform_5(%arg0: i32) -> (i32, i32, i32) {
    %c0_i32 = arith.constant 0 : i32
    %c0_i32_0 = arith.constant 0 : i32
    %c0_i32_1 = arith.constant 0 : i32
    return %arg0, %c0_i32, %c0_i32_0 : i32, i32, i32
  }
  func.func @transform_6(%arg0: i32) -> (i32, i32, i32) {
    %c0_i32 = arith.constant 0 : i32
    %c0_i32_0 = arith.constant 0 : i32
    %c0_i32_1 = arith.constant 0 : i32
    return %arg0, %c0_i32, %c0_i32_0 : i32, i32, i32
  }
}

</mosaic_0001>

<bundles_post_ra>
// kernel: tpu_custom_call.1
= control target key start
LH: loop header
LB: loop body
LE: loop exit
PB: predicated region body
PF: predicated region fallthrough
CT: control target
= control target key end

     0   :  { %12 = vsyncpa [#allocation4], 0  ;;  %s6647_s0 = inlined_call_operand.vmem [shape: bf16[2,9,9,512], index: 0, kind: input, shape index: {}]   ;;  %s6648_s1 = inlined_call_operand.vmem [shape: bf16[9,128,128], index: 1, kind: input, shape index: {}]   ;;  %s6649_s2 = inlined_call_operand.vmem [shape: f32[1,128], index: 2, kind: input, shape index: {}]   ;;  %s6650_s3 = inlined_call_operand.hbm [shape: bf16[9,128,128], index: 3, kind: input, shape index: {}]   ;;  %s6651_s4 = inlined_call_operand.vmem [shape: f32[1,128], index: 4, kind: input, shape index: {}]   ;;  %s6652_s5 = inlined_call_operand.hbm [shape: f32[2,64,128], index: 5, kind: output, shape index: {0}]   ;;  %s6653_s6 = inlined_call_operand.hbm [shape: f32[2,16,128], index: 6, kind: output, shape index: {1}]  }
   0x1   :  { %13 = vsyncpa [#allocation5], 0 }
   0x2   :  { %15 = vsyncpa [#allocation5 + $0x1], 0 }
   0x3   :  { %16 = vsyncpa [#allocation8], 0 }
   0x4   :  { %18 = vsyncpa [#allocation8 + $0x1], 0  ;;  %s5337_s21 = smov 0   ;;  %s5339_s22 = smov 0  }
   0x5   :  { %s5341_s23 = smov 0   ;;  %s5343_s24 = smov 0  }
   0x6 LB: > { %s5358_s25 = sadd.s32 4294967295, %s5290_s24   ;;  %s3998_s26 = sadd.s32 4294967294, %s5290_s24   ;;  %s5290_s24 = sphi %s5343_s24, %s6673_s24   ;;  %s5286_s23 = sphi %s5341_s23, %s6672_s23   ;;  %s5282_s22 = sphi %s5339_s22, %s6671_s22   ;;  %s5278_s21 = sphi %s5337_s21, %s6670_s21  }
   0x7   : > { %s5362_s27 = sadd.s32 1, %s5290_s24   ;;  %s141_s28 = sadd.s32 1, %s5286_s23 }
   0x8   : > { %s138_s29 = ssub.s32 %s5290_s24, %s5362_s27  ;;  %p151_p0 = scmp.ne.s32.totalorder %s5286_s23, %s5282_s22 }
   0x9   : > { %p139_p1 = scmp.eq.s32.totalorder %s138_s29, 0  ;;  %p152_p2 = scmp.eq.s32.totalorder %s5358_s25, 1 }
   0xa   : > { %p157_p3 = scmp.ne.s32.totalorder %s5282_s22, %s5278_s21  ;;  %p158_p4 = scmp.eq.s32.totalorder %s3998_s26, 1 }
   0xb   : > { %s5373_s30 = scalar_select %p139_p1, %s5286_s23, %s141_s28  }
   0xc   : > { %p5375_p5 = por %p152_p2, %p151_p0  ;;  %p5379_p6 = por %p158_p4, %p157_p3 }
   0xd   : > { %p3999_p7 = scmp.ge.s32.totalorder %s5290_s24, 1  ;;  %p191_p8 = scmp.lt.s32.totalorder %s5290_s24, 3 }
   0xe   : > { %s6655_s8 = scalar_select %p5379_p6, 1, 0 }
   0xf   : > { %p4973_p9 = scmp.eq.s32.totalorder %s5358_s25, 0  ;;  %p5386_p10 = pnand %p3999_p7, %p191_p8 }
  0x10   : > { %s5292_s10 = smov [#allocation3]  }
  0x11   : > { %s209_s11 = sshll.u32 %s5292_s10, 4  ;;  %p4962_p11 = pneg %p5386_p10  ;;  %s210_s11 = int_to_ptr.vmem [resolvable:$true] %s209_s11 }
  0x12   : > { %s5181_s12 = scalar_lea.vmem %s210_s11, 9216  ;;  %p5189_p3 = scmp.lt.s32.totalorder %s210_s11, %s210_s11 }
  0x13   : > { %p4963_p12 = pnand %p4973_p9, %p4962_p11  ;;  %p5182_p0 = scmp.ne.s32.totalorder %s210_s11, %s5181_s12 }
  0x14   : > { %p5190_p4 = scmp.lt.s32.totalorder %s5181_s12, %s5181_s12 }
  0x15   : > { %p5172_p13 = pneg %p4963_p12 }
  0x16   : > { %p5191_p6 = por %p5190_p4, %p5189_p3 }
  0x17   : > { %p5184_p1 = pnand %p5182_p0, %p5172_p13 }
  0x19   : > { %p5185_p2 = pneg %p5184_p1 }
  0x1b   : > { %p5192_p7 = pnand %p5191_p6, %p5185_p2 }
  0x1d   : > { %5195 = shalt.err (!%p5192_p7)
}
  0x1e   : > { %s5293_s13 = smov 64   ;;  %s5294_s14 = smov 4  }
  0x1f   : > { %4965 = dma.hbm_to_vmem [thread:$0]  (!%p4963_p12), %s6650_s3, 9216, %s210_s11, [#allocation4], %s5293_s13, %s5293_s13, %s5294_s14  }
  0x20   : > { %236 = sbr.rel (%p5386_p10) target bundleno = 773 (0x305), region = 40 }
  0x25   : > { %5265 = dma.done.wait (%p4973_p9), [#allocation4], 9216  }
  0x26   : > { %5267 = vsyncadd (%p4973_p9), [#allocation4], 4294958080  ;;  %v5295_v0 = vmov 0.0   ;;  %v5016_v1 = vld [vmem:[%s6648_s1 + $0x38] sm:$0xff]   ;;  %p271_p6 = scmp.lt.s32.totalorder %s5358_s25, 1  ;;  %v5018_v3 = vld [vmem:[%s6648_s1 + $0x30] sm:$0xff]  }
  0x27   : > { %2179 = vst [vmem:[#allocation2 + $0x90] sm:$0xff] %v5295_v0  ;;  %2162 = vst [vmem:[#allocation2 + $0x8] sm:$0x3] %v5295_v0  ;;  %v5017_v2 = vld [vmem:[%s6648_s1 + $0x78] sm:$0xff]   ;;  %4557 = vmatprep.subr.bf16.mxu0 %v5016_v1  ;;  %v5019_v4 = vld [vmem:[%s6648_s1 + $0x70] sm:$0xff]   ;;  %vm5296_vm3 = vmmov 0  }
  0x28   : > { %2163 = vst [vmem:[#allocation2 + $0x10] sm:$0xff] %v5295_v0  ;;  %2164 = vst [vmem:[#allocation2 + $0x18] sm:$0x3] %v5295_v0  ;;  %4558 = vmatpush3.bf16.msra.mxu0 %v5016_v1  ;;  %4581 = vmatprep.subr.bf16.mxu1 %v5017_v2  ;;  %v5020_v5 = vld [vmem:[%s6648_s1 + $0x28] sm:$0xff]   ;;  %s272_s14 = scalar_select %p271_p6, %s5358_s25, 1  ;;  %v5022_v7 = vld [vmem:[%s6648_s1 + $0x20] sm:$0xff]  }
  0x29   : > { %2165 = vst [vmem:[#allocation2 + $0x20] sm:$0xff] %v5295_v0  ;;  %2166 = vst [vmem:[#allocation2 + $0x28] sm:$0x3] %v5295_v0  ;;  %4582 = vmatpush3.bf16.msra.mxu1 %v5017_v2  ;;  %4559 = vmatprep.subr.bf16.mxu0 %v5018_v3  ;;  %v5021_v6 = vld [vmem:[%s6648_s1 + $0x68] sm:$0xff]   ;;  %v5023_v8 = vld [vmem:[%s6648_s1 + $0x60] sm:$0xff]   ;;  %s5979_s10 = sand.u32 1, %s5282_s22  }
  0x2a   : > { %2167 = vst [vmem:[#allocation2 + $0x30] sm:$0xff] %v5295_v0  ;;  %2168 = vst [vmem:[#allocation2 + $0x38] sm:$0x3] %v5295_v0  ;;  %4583 = vmatprep.subr.bf16.mxu1 %v5019_v4  ;;  %s4953_s19 = smul.u32 288, %s272_s14  ;;  %v5024_v9 = vld [vmem:[%s6648_s1 + $0x18] sm:$0xff]   ;;  %v5026_v11 = vld [vmem:[%s6648_s1 + $0x10] sm:$0xff]  }
  0x2b   : > { %2169 = vst [vmem:[#allocation2 + $0x40] sm:$0xff] %v5295_v0  ;;  %2170 = vst [vmem:[#allocation2 + $0x48] sm:$0x3] %v5295_v0  ;;  %v5025_v10 = vld [vmem:[%s6648_s1 + $0x58] sm:$0xff]   ;;  %v5027_v14 = vld [vmem:[%s6648_s1 + $0x50] sm:$0xff]   ;;  %s4004_s12 = sshll.u32 %s5979_s10, 6 }
  0x2c   : > { %2171 = vst [vmem:[#allocation2 + $0x50] sm:$0xff] %v5295_v0  ;;  %2172 = vst [vmem:[#allocation2 + $0x58] sm:$0x3] %v5295_v0  ;;  %4560 = vmatpush3.bf16.msra.mxu0 %v5018_v3  ;;  %s5438_s11 = scalar_lea.vmem %s6647_s0, %s4953_s19  ;;  %v5028_v19 = vld [vmem:[%s6648_s1 + $0x8] sm:$0xff]   ;;  %v5030_v21 = vld [vmem:[%s6648_s1] sm:$0xff]   ;;  %s6003_s13 = scalar_lea.vmem [#allocation6], %s4004_s12 }
  0x2d   : > { %2173 = vst [vmem:[#allocation2 + $0x60] sm:$0xff] %v5295_v0  ;;  %2174 = vst [vmem:[#allocation2 + $0x68] sm:$0x3] %v5295_v0  ;;  %4584 = vmatpush3.bf16.msra.mxu1 %v5019_v4  ;;  %4561 = vmatprep.subr.bf16.mxu0 %v5020_v5  ;;  %v284_v12 = vld [vmem:[%s5438_s11] sm:$0xf]  ;;  %v5029_v20 = vld [vmem:[%s6648_s1 + $0x48] sm:$0xff]  }
  0x2e   : > { %2175 = vst [vmem:[#allocation2 + $0x70] sm:$0xff] %v5295_v0  ;;  %2176 = vst [vmem:[#allocation2 + $0x78] sm:$0x3] %v5295_v0  ;;  %4585 = vmatprep.subr.bf16.mxu1 %v5021_v6  ;;  %v285_v13 = vld [vmem:[%s5438_s11 + $0x20] sm:$0xf]  ;;  %v5032_v25 = vld [vmem:[%s6648_s1 + $0xb8] sm:$0xff]  }
  0x2f   : > { %2177 = vst [vmem:[#allocation2 + $0x80] sm:$0xff] %v5295_v0  ;;  %2178 = vst [vmem:[#allocation2 + $0x88] sm:$0x3] %v5295_v0  ;;  %v4008_v15 = vcombine.low %v284_v12, %v285_v13  ;;  %v453_v16 = vld [vmem:[%s5438_s11 + $0x4] sm:$0xf]  ;;  %v5033_v28 = vld [vmem:[%s6648_s1 + $0xf8] sm:$0xff]  }
  0x30   : > { %4562 = vmatpush3.bf16.msra.mxu0 %v5020_v5  ;;  %v454_v17 = vld [vmem:[%s5438_s11 + $0x24] sm:$0xf]  ;;  %v286_v23 = vld [vmem:[%s5438_s11 + $0x40] sm:$0xf]  ;;  %v5034_v30 = vld [vmem:[%s6648_s1 + $0xb0] sm:$0xff]   ;;  %vm2567_vm4 = vcmask 1041409  }
  0x31   : > { %4586 = vmatpush3.bf16.msra.mxu1 %v5021_v6  ;;  %4563 = vmatprep.subr.bf16.mxu0 %v5022_v7  ;;  %v4036_v18 = vcombine.low %v453_v16, %v454_v17  ;;  %v5031_v22 = vld [vmem:[%s6648_s1 + $0x40] sm:$0xff]   ;;  %v5035_v36 = vld [vmem:[%s6648_s1 + $0xf0] sm:$0xff]   ;;  %vm639_vm0 = vsmask.f32 3328  ;;  %vm640_vm1 = vsmask.f32 7440 }
  0x32   : > { %4587 = vmatprep.subr.bf16.mxu1 %v5023_v8  ;;  %4573 = vmatprep.mubr.bf16.mxu0 %v4008_v15  ;;  %v287_v24 = vld [vmem:[%s5438_s11 + $0x60] sm:$0xf]  ;;  %v455_v26 = vld [vmem:[%s5438_s11 + $0x44] sm:$0xf]  ;;  %v5036_v43 = vld [vmem:[%s6648_s1 + $0xa8] sm:$0xff]   ;;  %vm2570_vm5 = vcmask 1042434  }
  0x33   : > { %4597 = vmatprep.mubr.bf16.mxu1 %v4036_v18  ;;  %v456_v27 = vld [vmem:[%s5438_s11 + $0x64] sm:$0xf]  ;;  %v4009_v29 = vcombine.low %v286_v23, %v287_v24  ;;  %v288_v31 = vld [vmem:[%s5438_s11 + $0x80] sm:$0xf]  ;;  %v5037_v44 = vld [vmem:[%s6648_s1 + $0xe8] sm:$0xff]   ;;  %vm2573_vm6 = vcmask 1043459  }
  0x34   : > { %4564 = vmatpush3.bf16.msra.mxu0 %v5022_v7  ;;  %v289_v32 = vld [vmem:[%s5438_s11 + $0xa0] sm:$0xf]  ;;  %v4037_v33 = vcombine.low %v455_v26, %v456_v27  ;;  %v457_v34 = vld [vmem:[%s5438_s11 + $0x84] sm:$0xf]  ;;  %v624_v46 = vld [vmem:[%s5438_s11 + $0x10] sm:$0x1] }
  0x35   : > { %4588 = vmatpush3.bf16.msra.mxu1 %v5023_v8  ;;  %4565 = vmatprep.subr.bf16.mxu0 %v5024_v9  ;;  %v458_v35 = vld [vmem:[%s5438_s11 + $0xa4] sm:$0xf]  ;;  %v4010_v37 = vcombine.low %v288_v31, %v289_v32  ;;  %v290_v38 = vld [vmem:[%s5438_s11 + $0xc0] sm:$0xf]  ;;  %v626_v50 = vld [vmem:[%s5438_s11 + $0x30] sm:$0x1] }
  0x36   : > { %4589 = vmatprep.subr.bf16.mxu1 %v5025_v10  ;;  %v291_v39 = vld [vmem:[%s5438_s11 + $0xe0] sm:$0xf]  ;;  %v4038_v40 = vcombine.low %v457_v34, %v458_v35  ;;  %v459_v41 = vld [vmem:[%s5438_s11 + $0xc4] sm:$0xf]  ;;  %v652_v53 = vshll.u32 %v624_v46, 16  ;;  %v666_v56 = vshll.u32 %v626_v50, 16  ;;  %vm5510_vm2 = vmor %vm639_vm0, %vm640_vm1 }
  0x37   : > { %v460_v42 = vld [vmem:[%s5438_s11 + $0xe4] sm:$0xf]  ;;  %v623_v45 = vld [vmem:[%s5438_s11] sm:$0xf]  ;;  %v4011_v47 = vcombine.low %v290_v38, %v291_v39  ;;  %v628_v1 = vld [vmem:[%s5438_s11 + $0x50] sm:$0x1] }
  0x38   : > { %4566 = vmatpush3.bf16.msra.mxu0 %v5024_v9  ;;  %v4039_v48 = vcombine.low %v459_v41, %v460_v42  ;;  %v625_v49 = vld [vmem:[%s5438_s11 + $0x20] sm:$0xf]  ;;  %v643_v51 = vshrl.u32 %v623_v45, 16  ;;  %v646_v52 = vshll.u32 %v623_v45, 16  ;;  %v654_v3 = vrot.slane %v652_v53, 5  ;;  %v5040_v6 = vld [vmem:[%s6648_s1 + $0x98] sm:$0xff]  }
  0x39   : > { %4590 = vmatpush3.bf16.msra.mxu1 %v5025_v10  ;;  %4567 = vmatprep.subr.bf16.mxu0 %v5026_v11  ;;  %v657_v54 = vshrl.u32 %v625_v49, 16  ;;  %v660_v55 = vshll.u32 %v625_v49, 16  ;;  %v627_v57 = vld [vmem:[%s5438_s11 + $0x40] sm:$0xf]  ;;  %v668_v9 = vrot.slane %v666_v56, 5  ;;  %v5041_v12 = vld [vmem:[%s6648_s1 + $0xd8] sm:$0xff]  }
  0x3a   : > { %4591 = vmatprep.subr.bf16.mxu1 %v5027_v14  ;;  %v5038_v58 = vld [vmem:[%s6648_s1 + $0xa0] sm:$0xff]   ;;  %v645_v59 = vrot.slane %v643_v51, 4  ;;  %v648_v60 = vrot.slane %v646_v52, 5  ;;  %v671_v4 = vshrl.u32 %v627_v57, 16  ;;  %v674_v5 = vshll.u32 %v627_v57, 16  ;;  %v5042_v26 = vld [vmem:[%s6648_s1 + $0x90] sm:$0xff]  }
  0x3b   : > { %v629_v61 = vld [vmem:[%s5438_s11 + $0x60] sm:$0xf]  ;;  %v659_v63 = vrot.slane %v657_v54, 4  ;;  %v662_v0 = vrot.slane %v660_v55, 5  ;;  %v908_v16 = vld [vmem:[%s5438_s11 + $0x8] sm:$0xf] }
  0x3c   : > { %4568 = vmatpush3.bf16.msra.mxu0 %v5026_v11  ;;  %v5039_v62 = vld [vmem:[%s6648_s1 + $0xe0] sm:$0xff]   ;;  %v649_v2 = vor.u32 %v648_v60, %v645_v59  ;;  %v685_v10 = vshrl.u32 %v629_v61, 16  ;;  %v688_v11 = vshll.u32 %v629_v61, 16  ;;  %v676_v15 = vrot.slane %v674_v5, 5  ;;  %v630_v18 = vld [vmem:[%s5438_s11 + $0x70] sm:$0x1] }
  0x3d   : > { %4592 = vmatpush3.bf16.msra.mxu1 %v5027_v14  ;;  %4569 = vmatprep.subr.bf16.mxu0 %v5028_v19  ;;  %v663_v8 = vor.u32 %v662_v0, %v659_v63  ;;  %v673_v14 = vrot.slane %v671_v4, 4  ;;  %v631_v32 = vld [vmem:[%s5438_s11 + $0x80] sm:$0xf]  ;;  %v632_v35 = vld [vmem:[%s5438_s11 + $0x90] sm:$0x1]  ;;  %v5045_v39 = vld [vmem:[%s6648_s1 + $0xc8] sm:$0xff]  }
  0x3e   : > { %4593 = vmatprep.subr.bf16.mxu1 %v5029_v20  ;;  %v650_v13 = vrot.slane %v649_v2, 4  ;;  %v690_v23 = vrot.slane %v688_v11, 5  ;;  %v702_v38 = vshll.u32 %v631_v32, 16  ;;  %v708_v49 = vshll.u32 %v632_v35, 16  ;;  %v637_v52 = vld [vmem:[%s5438_s11 + $0xe0] sm:$0xf] }
  0x3f   : > { %v664_v17 = vrot.slane %v663_v8, 4  ;;  %v638_v57 = vld [vmem:[%s5438_s11 + $0xf0] sm:$0x1]  ;;  %v741_v61 = vshrl.u32 %v637_v52, 16  ;;  %v5046_v63 = vld [vmem:[%s6648_s1 + $0x80] sm:$0xff]   ;;  %v5048_v8 = vld [vmem:[%s6648_s1 + $0x138] sm:$0xff]  }
  0x40   : > { %4570 = vmatpush3.bf16.msra.mxu0 %v5028_v19  ;;  %v680_v19 = vshll.u32 %v628_v1, 16  ;;  %v750_v2 = vshll.u32 %v638_v57, 16  ;;  %v710_v4 = vrot.slane %v708_v49, 5  ;;  %v5052_v35 = vld [vmem:[%s6648_s1 + $0x128] sm:$0xff]   ;;  %v1253_v57 = vld [vmem:[%s5438_s11 + $0x58] sm:$0x1] }
  0x41   : > { %4594 = vmatpush3.bf16.msra.mxu1 %v5029_v20  ;;  %4571 = vmatprep.subr.bf16.mxu0 %v5030_v21  ;;  %v909_v20 = vld [vmem:[%s5438_s11 + $0x28] sm:$0xf]  ;;  %v743_v5 = vrot.slane %v741_v61, 4  ;;  %vm2576_vm7 = vcmask 1044484   ;;  %vm2579_vm8 = vcmask 1045509   ;;  %vm2582_vm9 = vcmask 1046534  }
  0x42   : > { %4595 = vmatprep.subr.bf16.mxu1 %v5031_v22  ;;  %v4092_v24 = vcombine.low %v908_v16, %v909_v20  ;;  %v5530_v31 = vrot.slane %v680_v19, 5  ;;  %v911_v16 = vld [vmem:[%s5438_s11 + $0x68] sm:$0xf]  ;;  %v752_v20 = vrot.slane %v750_v2, 5  ;;  %vm2585_vm10 = vcmask 1047559   ;;  %s3876_s15 = sshll.u32 %s6003_s13, 4  ;;  %s6563_s15 = int_to_ptr.vmem [resolvable:$true] %s3876_s15 }
  0x43   : > { %v1254_v61 = vld [vmem:[%s5438_s11 + $0x68] sm:$0xf]  ;;  %s4366_s16 = sshll.u32 %s5358_s25, 10  ;;  %s3858_s20 = scalar_lea.sflag [#allocation5], %s5979_s10 }
  0x44   : > { %4572 = vmatpush3.bf16.msra.mxu0 %v5030_v21  ;;  %v655_v21 = vsel %vm5510_vm2, %v650_v13, %v654_v3  ;;  %v5047_v3 = vld [vmem:[%s6648_s1 + $0xc0] sm:$0xff]   ;;  %v5092_v7 = vld [vmem:[#allocation3 + $0x28] sm:$0xff]   ;;  %s6569_s19 = scalar_lea.hbm %s6652_s5, %s4366_s16  ;;  %s5196_s26 = scalar_lea.vmem %s6563_s15, 1024 }
  0x45   : > { %4596 = vmatpush3.bf16.msra.mxu1 %v5031_v22  ;;  %4605 = vmatprep.subr.bf16.mxu0 %v5032_v25  ;;  %v687_v22 = vrot.slane %v685_v10, 4  ;;  %p5197_p8 = scmp.ne.s32.totalorder %s6563_s15, %s5196_s26  ;;  %s5298_s28 = smov [#allocation6]  }
  0x46   : > { %4629 = vmatprep.subr.bf16.mxu1 %v5033_v28  ;;  %s5200_s29 = sshll.u32 %s5298_s28, 4  ;;  %s5201_s29 = int_to_ptr.vmem [resolvable:$false] %s5200_s29 }
  0x47   : > { %4574 = vmatmul.mubr.bf16.vlgmr.msra.gmra.mxu0 %v4009_v29  ;;  %v694_v29 = vshll.u32 %v630_v18, 16  ;;  %v691_v34 = vor.u32 %v690_v23, %v687_v22  ;;  %v912_v23 = vld [vmem:[%s5438_s11 + $0x88] sm:$0xf]  ;;  %p5198_p9 = pnand %p5197_p8, %p5375_p5  ;;  %s5202_s9 = scalar_lea.vmem %s5201_s29, 2048 }
  0x48   : > { %4606 = vmatpush3.bf16.msra.mxu0 %v5032_v25  ;;  %4598 = vmatmul.mubr.bf16.vlgmr.msra.gmra.mxu1 %v4037_v33  ;;  %v669_v25 = vsel %vm5510_vm2, %v664_v17, %v668_v9  ;;  %v5044_v33 = vld [vmem:[%s6648_s1 + $0x88] sm:$0xff]   ;;  %v5049_v17 = vld [vmem:[%s6648_s1 + $0x178] sm:$0xff]   ;;  %p5203_p11 = scmp.lt.s32.totalorder %s6563_s15, %s5201_s29  ;;  %p5204_p12 = scmp.lt.s32.totalorder %s5202_s9, %s5196_s26 }
  0x49   : > { %4630 = vmatpush3.bf16.msra.mxu1 %v5033_v28  ;;  %4607 = vmatprep.subr.bf16.mxu0 %v5034_v30  ;;  %v4064_v27 = vcombine.low %v655_v21, %v669_v25  ;;  %v677_v28 = vor.u32 %v676_v15, %v673_v14  ;;  %v696_v45 = vrot.slane %v694_v29, 5  ;;  %v692_v54 = vrot.slane %v691_v34, 4  ;;  %v910_v9 = vld [vmem:[%s5438_s11 + $0x48] sm:$0xf]  ;;  %p5199_p10 = pneg %p5198_p9 }
  0x4a   : > { %4631 = vmatprep.subr.bf16.mxu1 %v5035_v36  ;;  %4577 = vmatprep.mubr.bf16.mxu0 %v4010_v37  ;;  %v699_v37 = vshrl.u32 %v631_v32, 16  ;;  %v4093_v29 = vcombine.low %v910_v9, %v911_v16  ;;  %v5057_v9 = vld [vmem:[%s6648_s1 + $0x158] sm:$0xff]   ;;  %p5205_p13 = por %p5204_p12, %p5203_p11 }
  0x4b   : > { %4601 = vmatprep.mubr.bf16.mxu1 %v4038_v40  ;;  %v634_v40 = vld [vmem:[%s5438_s11 + $0xb0] sm:$0x1]  ;;  %v697_v15 = vsel %vm5510_vm2, %v692_v54, %v696_v45  ;;  %v1248_v45 = vld [vmem:[%s5438_s11 + $0x8] sm:$0xf] }
  0x4c   : > { %4608 = vmatpush3.bf16.msra.mxu0 %v5034_v30  ;;  %v5043_v30 = vld [vmem:[%s6648_s1 + $0xd0] sm:$0xff]   ;;  %v701_v46 = vrot.slane %v699_v37, 4  ;;  %v722_v56 = vshll.u32 %v634_v40, 16  ;;  %v915_v37 = vld [vmem:[%s5438_s11 + $0xe8] sm:$0xf]  ;;  %v1265_v49 = vshrl.u32 %v1248_v45, 16  ;;  %p5206_p0 = pnand %p5205_p13, %p5199_p10 }
  0x4d   : > { %4632 = vmatpush3.bf16.msra.mxu1 %v5035_v36  ;;  %4609 = vmatprep.subr.bf16.mxu0 %v5036_v43  ;;  %v633_v36 = vld [vmem:[%s5438_s11 + $0xa0] sm:$0xf] }
  0x4e   : > { %4633 = vmatprep.subr.bf16.mxu1 %v5037_v44  ;;  %v713_v41 = vshrl.u32 %v633_v36, 16  ;;  %v716_v42 = vshll.u32 %v633_v36, 16  ;;  %v914_v36 = vld [vmem:[%s5438_s11 + $0xc8] sm:$0xf] }
  0x4f   : > { %4578 = vmatmul.mubr.bf16.gmra.mxu0 %v4011_v47  ;;  %v704_v47 = vrot.slane %v702_v38, 5  ;;  %v5053_v38 = vld [vmem:[%s6648_s1 + $0x168] sm:$0xff]  }
  0x50   : > { %4610 = vmatpush3.bf16.msra.mxu0 %v5036_v43  ;;  %4602 = vmatmul.mubr.bf16.gmra.mxu1 %v4039_v48  ;;  %v635_v43 = vld [vmem:[%s5438_s11 + $0xc0] sm:$0xf]  ;;  %v636_v48 = vld [vmem:[%s5438_s11 + $0xd0] sm:$0x1]  ;;  %v715_v50 = vrot.slane %v713_v41, 4  ;;  %v718_v51 = vrot.slane %v716_v42, 5 }
  0x51   : > { %4634 = vmatpush3.bf16.msra.mxu1 %v5037_v44  ;;  %4611 = vmatprep.subr.bf16.mxu0 %v5038_v58  ;;  %v678_v44 = vrot.slane %v677_v28, 4  ;;  %v727_v53 = vshrl.u32 %v635_v43, 16  ;;  %v705_v55 = vor.u32 %v704_v47, %v701_v46  ;;  %v736_v1 = vshll.u32 %v636_v48, 16  ;;  %v5054_v41 = vld [vmem:[%s6648_s1 + $0x120] sm:$0xff]   ;;  %v1079_v42 = vld [vmem:[%s5438_s11 + $0x2c] sm:$0xf] }
  0x52   : > { %4635 = vmatprep.subr.bf16.mxu1 %v5039_v62  ;;  %4645 = vmatprep.mubr.bf16.mxu1 %v4092_v24  ;;  %v719_v59 = vor.u32 %v718_v51, %v715_v50  ;;  %v913_v24 = vld [vmem:[%s5438_s11 + $0xa8] sm:$0xf]  ;;  %v1249_v46 = vld [vmem:[%s5438_s11 + $0x18] sm:$0x1]  ;;  %v1268_v50 = vshll.u32 %v1248_v45, 16 }
  0x53   : > { %4621 = vmatprep.mubr.bf16.mxu0 %v4064_v27  ;;  %v729_v60 = vrot.slane %v727_v53, 4  ;;  %v706_v10 = vrot.slane %v705_v55, 4  ;;  %v683_v14 = vsel %vm5510_vm2, %v678_v44, %v5530_v31  ;;  %v738_v19 = vrot.slane %v736_v1, 5  ;;  %v5055_v44 = vld [vmem:[%s6648_s1 + $0x160] sm:$0xff]   ;;  %v1250_v47 = vld [vmem:[%s5438_s11 + $0x28] sm:$0xf] }
  0x54   : > { %4612 = vmatpush3.bf16.msra.mxu0 %v5038_v58  ;;  %v730_v58 = vshll.u32 %v635_v43, 16  ;;  %v720_v11 = vrot.slane %v719_v59, 4  ;;  %v4065_v25 = vcombine.low %v683_v14, %v697_v15  ;;  %v4094_v32 = vcombine.low %v912_v23, %v913_v24  ;;  %v1251_v48 = vld [vmem:[%s5438_s11 + $0x38] sm:$0x1]  ;;  %v5059_v23 = vld [vmem:[%s6648_s1 + $0x150] sm:$0xff]  }
  0x55   : > { %4636 = vmatpush3.bf16.msra.mxu1 %v5039_v62  ;;  %4613 = vmatprep.subr.bf16.mxu0 %v5040_v6  ;;  %v744_v62 = vshll.u32 %v637_v52, 16  ;;  %v711_v27 = vsel %vm5510_vm2, %v706_v10, %v710_v4  ;;  %v4095_v43 = vcombine.low %v914_v36, %v915_v37  ;;  %v1274_v51 = vshll.u32 %v1249_v46, 16  ;;  %v5061_v37 = vld [vmem:[%s6648_s1 + $0x148] sm:$0xff]   ;;  %v1261_v45 = vld [vmem:[%s5438_s11 + $0xd8] sm:$0x1] }
  0x56   : > { %4637 = vmatprep.subr.bf16.mxu1 %v5041_v12  ;;  %v732_v0 = vrot.slane %v730_v58, 5  ;;  %v1279_v52 = vshrl.u32 %v1250_v47, 16  ;;  %v1282_v54 = vshll.u32 %v1250_v47, 16  ;;  %v1288_v55 = vshll.u32 %v1251_v48, 16 }
  0x57   : > { %v1267_v58 = vrot.slane %v1265_v49, 4  ;;  %v1270_v59 = vrot.slane %v1268_v50, 5  ;;  %v1262_v50 = vld [vmem:[%s5438_s11 + $0xe8] sm:$0xf] }
  0x58   : > { %4614 = vmatpush3.bf16.msra.mxu0 %v5040_v6  ;;  %v746_v6 = vrot.slane %v744_v62, 5  ;;  %v733_v13 = vor.u32 %v732_v0, %v729_v60  ;;  %v1281_v60 = vrot.slane %v1279_v52, 4  ;;  %v1276_v62 = vrot.slane %v1274_v51, 5  ;;  %v1255_v0 = vld [vmem:[%s5438_s11 + $0x78] sm:$0x1]  ;;  %v5062_v52 = vld [vmem:[%s6648_s1 + $0x100] sm:$0xff]  }
  0x59   : > { %4638 = vmatpush3.bf16.msra.mxu1 %v5041_v12  ;;  %4615 = vmatprep.subr.bf16.mxu0 %v5042_v26  ;;  %v724_v12 = vrot.slane %v722_v56, 5  ;;  %v1252_v56 = vld [vmem:[%s5438_s11 + $0x48] sm:$0xf]  ;;  %v1271_v4 = vor.u32 %v1270_v59, %v1267_v58  ;;  %v5063_v58 = vld [vmem:[%s6648_s1 + $0x140] sm:$0xff]   ;;  %v1080_v59 = vld [vmem:[%s5438_s11 + $0x4c] sm:$0xf] }
  0x5a   : > { %4639 = vmatprep.subr.bf16.mxu1 %v5043_v30  ;;  %v747_v18 = vor.u32 %v746_v6, %v743_v5  ;;  %v734_v21 = vrot.slane %v733_v13, 4  ;;  %v1293_v1 = vshrl.u32 %v1252_v56, 16  ;;  %v1296_v2 = vshll.u32 %v1252_v56, 16 }
  0x5b   : > { %v725_v28 = vsel %vm5510_vm2, %v720_v11, %v724_v12  ;;  %v1290_v5 = vrot.slane %v1288_v55, 5  ;;  %v1307_v6 = vshrl.u32 %v1254_v61, 16  ;;  %v1302_v13 = vshll.u32 %v1253_v57, 16  ;;  %v1263_v55 = vld [vmem:[%s5438_s11 + $0xf8] sm:$0x1] }
  0x5c   : > { %4616 = vmatpush3.bf16.msra.mxu0 %v5042_v26  ;;  %v748_v22 = vrot.slane %v747_v18, 4  ;;  %v5050_v26 = vld [vmem:[%s6648_s1 + $0x130] sm:$0xff]   ;;  %v4066_v31 = vcombine.low %v711_v27, %v725_v28  ;;  %v1295_v11 = vrot.slane %v1293_v1, 4  ;;  %v1298_v12 = vrot.slane %v1296_v2, 5  ;;  %v5064_v1 = vld [vmem:[%s6648_s1 + $0x1b8] sm:$0xff]  }
  0x5d   : > { %4640 = vmatpush3.bf16.msra.mxu1 %v5043_v30  ;;  %4617 = vmatprep.subr.bf16.mxu0 %v5044_v33  ;;  %v5051_v30 = vld [vmem:[%s6648_s1 + $0x170] sm:$0xff]   ;;  %v1272_v14 = vrot.slane %v1271_v4, 4  ;;  %v1309_v15 = vrot.slane %v1307_v6, 4  ;;  %v1358_v57 = vshll.u32 %v1261_v45, 16  ;;  %v5065_v6 = vld [vmem:[%s6648_s1 + $0x1f8] sm:$0xff]  }
  0x5e   : > { %4641 = vmatprep.subr.bf16.mxu1 %v5045_v39  ;;  %v753_v34 = vsel %vm5510_vm2, %v748_v22, %v752_v20  ;;  %v5058_v20 = vld [vmem:[%s6648_s1 + $0x110] sm:$0xff]  }
  0x5f   : > { %v5074_v45 = vld [vmem:[%s6648_s1 + $0x190] sm:$0xff]  }
  0x60   : > { %4618 = vmatpush3.bf16.msra.mxu0 %v5044_v33  ;;  %v739_v33 = vsel %vm5510_vm2, %v734_v21, %v738_v19  ;;  %v1299_v19 = vor.u32 %v1298_v12, %v1295_v11  ;;  %v1277_v21 = vsel %vm5510_vm2, %v1272_v14, %v1276_v62  ;;  %v1082_v12 = vld [vmem:[%s5438_s11 + $0x8c] sm:$0xf]  ;;  %v1360_v14 = vrot.slane %v1358_v57, 5  ;;  %v4236_v57 = vld [vmem:[%s5438_s11 + $0x60] sm:$0xf] }
  0x61   : > { %4642 = vmatpush3.bf16.msra.mxu1 %v5045_v39  ;;  %4619 = vmatprep.subr.bf16.mxu0 %v5046_v63  ;;  %v1078_v39 = vld [vmem:[%s5438_s11 + $0xc] sm:$0xf]  ;;  %v4067_v40 = vcombine.low %v739_v33, %v753_v34  ;;  %v1258_v33 = vld [vmem:[%s5438_s11 + $0xa8] sm:$0xf]  ;;  %v1259_v34 = vld [vmem:[%s5438_s11 + $0xb8] sm:$0x1] }
  0x62   : > { %4643 = vmatprep.subr.bf16.mxu1 %v5047_v3  ;;  %v4120_v53 = vcombine.low %v1078_v39, %v1079_v42  ;;  %v5626_v28 = vrot.slane %v1299_v19, 4  ;;  %v1335_v39 = vshrl.u32 %v1258_v33, 16  ;;  %v5066_v19 = vld [vmem:[%s6648_s1 + $0x1b0] sm:$0xff]  }
  0x64   : > { %4620 = vmatpush3.bf16.msra.mxu0 %v5046_v63  ;;  %v1284_v63 = vrot.slane %v1282_v54, 5  ;;  %v1337_v48 = vrot.slane %v1335_v39, 4  ;;  %v5070_v39 = vld [vmem:[%s6648_s1 + $0x1a0] sm:$0xff]  }
  0x65   : > { %4644 = vmatpush3.bf16.msra.mxu1 %v5047_v3  ;;  %4653 = vmatprep.subr.bf16.mxu0 %v5048_v8  ;;  %v5056_v3 = vld [vmem:[%s6648_s1 + $0x118] sm:$0xff]  }
  0x66   : > { %4677 = vmatprep.subr.bf16.mxu1 %v5049_v17  ;;  %v1285_v10 = vor.u32 %v1284_v63, %v1281_v60  ;;  %v1081_v60 = vld [vmem:[%s5438_s11 + $0x6c] sm:$0xf]  ;;  %v1363_v63 = vshrl.u32 %v1262_v50, 16 }
  0x67   : > { %4622 = vmatmul.mubr.bf16.vlgmr.msra.gmra.mxu0 %v4065_v25  ;;  %v5621_v25 = vrot.slane %v1302_v13, 5  ;;  %v1083_v13 = vld [vmem:[%s5438_s11 + $0xac] sm:$0xf] }
  0x68   : > { %4654 = vmatpush3.bf16.msra.mxu0 %v5048_v8  ;;  %4646 = vmatmul.mubr.bf16.vlgmr.msra.gmra.mxu1 %v4093_v29  ;;  %v1310_v8 = vshll.u32 %v1254_v61, 16  ;;  %v1286_v18 = vrot.slane %v1285_v10, 4  ;;  %v1365_v10 = vrot.slane %v1363_v63, 4 }
  0x69   : > { %4678 = vmatpush3.bf16.msra.mxu1 %v5049_v17  ;;  %4655 = vmatprep.subr.bf16.mxu0 %v5050_v26  ;;  %v1316_v17 = vshll.u32 %v1255_v0, 16  ;;  %v1305_v47 = vsel %vm5510_vm2, %v5626_v28, %v5621_v25  ;;  %v1366_v0 = vshll.u32 %v1262_v50, 16  ;;  %v4122_v25 = vcombine.low %v1082_v12, %v1083_v13  ;;  %v1085_v28 = vld [vmem:[%s5438_s11 + $0xec] sm:$0xf]  ;;  %v4235_v50 = vld [vmem:[%s5438_s11 + $0x50] sm:$0x1] }
  0x6a   : > { %4679 = vmatprep.subr.bf16.mxu1 %v5051_v30  ;;  %4625 = vmatprep.mubr.bf16.mxu0 %v4066_v31  ;;  %v1312_v16 = vrot.slane %v1310_v8, 5  ;;  %v1291_v24 = vsel %vm5510_vm2, %v1286_v18, %v1290_v5  ;;  %v1256_v31 = vld [vmem:[%s5438_s11 + $0x88] sm:$0xf]  ;;  %v1372_v5 = vshll.u32 %v1263_v55, 16 }
  0x6b   : > { %4649 = vmatprep.mubr.bf16.mxu1 %v4094_v32  ;;  %v4148_v27 = vcombine.low %v1277_v21, %v1291_v24  ;;  %v1257_v32 = vld [vmem:[%s5438_s11 + $0x98] sm:$0x1]  ;;  %v1324_v36 = vshll.u32 %v1256_v31, 16  ;;  %v1368_v11 = vrot.slane %v1366_v0, 5 }
  0x6c   : > { %4656 = vmatpush3.bf16.msra.mxu0 %v5050_v26  ;;  %v1313_v22 = vor.u32 %v1312_v16, %v1309_v15  ;;  %v5060_v26 = vld [vmem:[%s6648_s1 + $0x108] sm:$0xff]   ;;  %v1374_v16 = vrot.slane %v1372_v5, 5  ;;  %v4239_v5 = vld [vmem:[%s5438_s11 + $0x90] sm:$0x1] }
  0x6d   : > { %4680 = vmatpush3.bf16.msra.mxu1 %v5051_v30  ;;  %4657 = vmatprep.subr.bf16.mxu0 %v5052_v35  ;;  %v5630_v30 = vrot.slane %v1316_v17, 5  ;;  %v1369_v15 = vor.u32 %v1368_v11, %v1365_v10  ;;  %v4121_v17 = vcombine.low %v1080_v59, %v1081_v60  ;;  %v4237_v60 = vld [vmem:[%s5438_s11 + $0x70] sm:$0x1]  ;;  %v5732_v10 = vld [vmem:[%s5438_s11 + $0x80] sm:$0xf] }
  0x6e   : > { %4681 = vmatprep.subr.bf16.mxu1 %v5053_v38  ;;  %v5628_v29 = vrot.slane %v1313_v22, 4 }
  0x6f   : > { %4626 = vmatmul.mubr.bf16.gmra.mxu0 %v4067_v40  ;;  %v1338_v40 = vshll.u32 %v1258_v33, 16  ;;  %v1370_v24 = vrot.slane %v1369_v15, 4  ;;  %v5079_v15 = vld [vmem:[%s6648_s1 + $0x1c0] sm:$0xff]  }
  0x70   : > { %4658 = vmatpush3.bf16.msra.mxu0 %v5052_v35  ;;  %4650 = vmatmul.mubr.bf16.gmra.mxu1 %v4095_v43  ;;  %v1321_v35 = vshrl.u32 %v1256_v31, 16  ;;  %v1326_v43 = vrot.slane %v1324_v36, 5 }
  0x71   : > { %4682 = vmatpush3.bf16.msra.mxu1 %v5053_v38  ;;  %4659 = vmatprep.subr.bf16.mxu0 %v5054_v41  ;;  %v1330_v38 = vshll.u32 %v1257_v32, 16  ;;  %v1340_v49 = vrot.slane %v1338_v40, 5  ;;  %v1375_v31 = vsel %vm5510_vm2, %v1370_v24, %v1374_v16  ;;  %v5069_v32 = vld [vmem:[%s6648_s1 + $0x1e8] sm:$0xff]   ;;  %v5071_v40 = vld [vmem:[%s6648_s1 + $0x1e0] sm:$0xff]  }
  0x72   : > { %4683 = vmatprep.subr.bf16.mxu1 %v5055_v44  ;;  %4669 = vmatprep.mubr.bf16.mxu0 %v4120_v53  ;;  %v1323_v42 = vrot.slane %v1321_v35, 4  ;;  %v1319_v53 = vsel %vm5510_vm2, %v5628_v29, %v5630_v30  ;;  %v5068_v29 = vld [vmem:[%s6648_s1 + $0x1a8] sm:$0xff]   ;;  %v4161_v35 = vld [vmem:[%s5438_s11 + $0x40] sm:$0xf]  ;;  %v5739_v16 = vld [vmem:[%s5438_s11 + $0x64] sm:$0xf] }
  0x73   : > { %4693 = vmatprep.mubr.bf16.mxu1 %v4148_v27  ;;  %v1341_v61 = vor.u32 %v1340_v49, %v1337_v48  ;;  %v4149_v18 = vcombine.low %v1305_v47, %v1319_v53  ;;  %v4232_v47 = vld [vmem:[%s5438_s11 + $0x20] sm:$0xf]  ;;  %v4233_v48 = vld [vmem:[%s5438_s11 + $0x30] sm:$0x1]  ;;  %v5076_v53 = vld [vmem:[%s6648_s1 + $0x188] sm:$0xff]  }
  0x74   : > { %4660 = vmatpush3.bf16.msra.mxu0 %v5054_v41  ;;  %v1260_v41 = vld [vmem:[%s5438_s11 + $0xc8] sm:$0xf]  ;;  %v1327_v54 = vor.u32 %v1326_v43, %v1323_v42  ;;  %v5072_v43 = vld [vmem:[%s6648_s1 + $0x198] sm:$0xff]   ;;  %v4234_v49 = vld [vmem:[%s5438_s11 + $0x40] sm:$0xf] }
  0x75   : > { %4684 = vmatpush3.bf16.msra.mxu1 %v5055_v44  ;;  %4661 = vmatprep.subr.bf16.mxu0 %v5056_v3  ;;  %v1344_v44 = vshll.u32 %v1259_v34, 16  ;;  %v1349_v46 = vshrl.u32 %v1260_v41, 16  ;;  %v1352_v51 = vshll.u32 %v1260_v41, 16  ;;  %v1342_v8 = vrot.slane %v1341_v61, 4  ;;  %v4160_v34 = vld [vmem:[%s5438_s11 + $0x20] sm:$0xf] }
  0x76   : > { %4685 = vmatprep.subr.bf16.mxu1 %v5057_v9  ;;  %v1328_v2 = vrot.slane %v1327_v54, 4  ;;  %v4184_v41 = vcombine.low %v4160_v34, %v4161_v35  ;;  %v1897_v54 = vshll.u32 %v4233_v48, 16  ;;  %v1902_v55 = vshrl.u32 %v4234_v49, 16  ;;  %v4238_v61 = vld [vmem:[%s5438_s11 + $0x80] sm:$0xf] }
  0x77   : > { %v1351_v56 = vrot.slane %v1349_v46, 4  ;;  %v1354_v62 = vrot.slane %v1352_v51, 5  ;;  %v1346_v4 = vrot.slane %v1344_v44, 5  ;;  %v5073_v44 = vld [vmem:[%s6648_s1 + $0x1d8] sm:$0xff]   ;;  %v5075_v46 = vld [vmem:[%s6648_s1 + $0x1d0] sm:$0xff]   ;;  %v1888_v51 = vshrl.u32 %v4232_v47, 16 }
  0x78   : > { %4662 = vmatpush3.bf16.msra.mxu0 %v5056_v3  ;;  %v1332_v3 = vrot.slane %v1330_v38, 5  ;;  %v4197_v38 = vld [vmem:[%s5438_s11 + $0x44] sm:$0xf]  ;;  %v1904_v63 = vrot.slane %v1902_v55, 4  ;;  %v1930_v12 = vshrl.u32 %v4238_v61, 16  ;;  %v1933_v13 = vshll.u32 %v4238_v61, 16 }
  0x79   : > { %4686 = vmatpush3.bf16.msra.mxu1 %v5057_v9  ;;  %4663 = vmatprep.subr.bf16.mxu0 %v5058_v20  ;;  %v1355_v9 = vor.u32 %v1354_v62, %v1351_v56  ;;  %v1347_v22 = vsel %vm5510_vm2, %v1342_v8, %v1346_v4  ;;  %v1905_v56 = vshll.u32 %v4234_v49, 16  ;;  %v5077_v62 = vld [vmem:[%s6648_s1 + $0x1c8] sm:$0xff]   ;;  %v1919_v8 = vshll.u32 %v4236_v57, 16  ;;  %v5754_v24 = vld [vmem:[%s5438_s11 + $0xa4] sm:$0xf] }
  0x7a   : > { %4687 = vmatprep.subr.bf16.mxu1 %v5059_v23  ;;  %v1333_v21 = vsel %vm5510_vm2, %v1328_v2, %v1332_v3  ;;  %v5078_v2 = vld [vmem:[%s6648_s1 + $0x180] sm:$0xff]  }
  0x7b   : > { %v4150_v27 = vcombine.low %v1333_v21, %v1347_v22  ;;  %v1907_v0 = vrot.slane %v1905_v56, 5  ;;  %v5728_v3 = vld [vmem:[%s5438_s11 + $0x60] sm:$0xf]  ;;  %v1921_v22 = vrot.slane %v1919_v8, 5 }
  0x7c   : > { %4664 = vmatpush3.bf16.msra.mxu0 %v5058_v20  ;;  %v5067_v20 = vld [vmem:[%s6648_s1 + $0x1f0] sm:$0xff]  }
  0x7d   : > { %4688 = vmatpush3.bf16.msra.mxu1 %v5059_v23  ;;  %4665 = vmatprep.subr.bf16.mxu0 %v5060_v26  ;;  %v1356_v23 = vrot.slane %v1355_v9, 4  ;;  %v1925_v9 = vshll.u32 %v4237_v60, 16  ;;  %v1908_v11 = vor.u32 %v1907_v0, %v1904_v63 }
  0x7e   : > { %4689 = vmatprep.subr.bf16.mxu1 %v5061_v37 }
  0x7f   : > { %v1361_v30 = vsel %vm5510_vm2, %v1356_v23, %v1360_v14  ;;  %v4240_v14 = vld [vmem:[%s5438_s11 + $0xa0] sm:$0xf] }
  0x80   : > { %4666 = vmatpush3.bf16.msra.mxu0 %v5060_v26  ;;  %v1084_v26 = vld [vmem:[%s5438_s11 + $0xcc] sm:$0xf]  ;;  %v4151_v36 = vcombine.low %v1361_v30, %v1375_v31  ;;  %v4242_v23 = vld [vmem:[%s5438_s11 + $0xc0] sm:$0xf]  ;;  %v4241_v30 = vld [vmem:[%s5438_s11 + $0xb0] sm:$0x1] }
  0x81   : > { %4690 = vmatpush3.bf16.msra.mxu1 %v5061_v37  ;;  %4667 = vmatprep.subr.bf16.mxu0 %v5062_v52  ;;  %v4123_v33 = vcombine.low %v1084_v26, %v1085_v28  ;;  %v4196_v37 = vld [vmem:[%s5438_s11 + $0x24] sm:$0xf]  ;;  %v1935_v28 = vrot.slane %v1933_v13, 5  ;;  %v1944_v34 = vshrl.u32 %v4240_v14, 16  ;;  %v1947_v35 = vshll.u32 %v4240_v14, 16 }
  0x82   : > { %4691 = vmatprep.subr.bf16.mxu1 %v5063_v58  ;;  %v4220_v42 = vcombine.low %v4196_v37, %v4197_v38  ;;  %v5769_v37 = vrot.slane %v1908_v11, 4  ;;  %v4202_v11 = vld [vmem:[%s5438_s11 + $0xe4] sm:$0xf] }
  0x84   : > { %4668 = vmatpush3.bf16.msra.mxu0 %v5062_v52  ;;  %v1891_v52 = vshll.u32 %v4232_v47, 16  ;;  %v4246_v47 = vld [vmem:[%s5438_s11 + $0x100] sm:$0xf] }
  0x85   : > { %4692 = vmatpush3.bf16.msra.mxu1 %v5063_v58  ;;  %4701 = vmatprep.subr.bf16.mxu0 %v5064_v1  ;;  %v1890_v58 = vrot.slane %v1888_v51, 4  ;;  %v1961_v51 = vshll.u32 %v4242_v23, 16  ;;  %v1986_v8 = vshrl.u32 %v4246_v47, 16  ;;  %v1989_v13 = vshll.u32 %v4246_v47, 16  ;;  %v5090_v47 = vld [vmem:[#allocation3 + $0x30] sm:$0xff]  }
  0x86   : > { %4725 = vmatprep.subr.bf16.mxu1 %v5065_v6  ;;  %v1893_v59 = vrot.slane %v1891_v52, 5  ;;  %v4247_v52 = vld [vmem:[%s5438_s11 + $0x110] sm:$0x1] }
  0x87   : > { %4670 = vmatmul.mubr.bf16.vlgmr.msra.gmra.mxu0 %v4121_v17  ;;  %v5742_v17 = vld [vmem:[%s5438_s11 + $0x84] sm:$0xf]  ;;  %v1995_v14 = vshll.u32 %v4247_v52, 16 }
  0x88   : > { %4702 = vmatpush3.bf16.msra.mxu0 %v5064_v1  ;;  %4694 = vmatmul.mubr.bf16.vlgmr.msra.gmra.mxu1 %v4149_v18  ;;  %v1911_v1 = vshll.u32 %v4235_v50, 16  ;;  %v1894_v4 = vor.u32 %v1893_v59, %v1890_v58  ;;  %v5745_v18 = vld [vmem:[%s5438_s11 + $0xa0] sm:$0xf]  ;;  %v4221_v48 = vcombine.low %v5739_v16, %v5742_v17  ;;  %v1963_v59 = vrot.slane %v1961_v51, 5 }
  0x89   : > { %4726 = vmatpush3.bf16.msra.mxu1 %v5065_v6  ;;  %4703 = vmatprep.subr.bf16.mxu0 %v5066_v19  ;;  %v1916_v6 = vshrl.u32 %v4236_v57, 16  ;;  %v1988_v16 = vrot.slane %v1986_v8, 4  ;;  %v5094_v52 = vld [vmem:[#allocation3 + $0x20] sm:$0xff]  }
  0x8a   : > { %4727 = vmatprep.subr.bf16.mxu1 %v5067_v20  ;;  %4673 = vmatprep.mubr.bf16.mxu0 %v4122_v25  ;;  %v5757_v25 = vld [vmem:[%s5438_s11 + $0xc4] sm:$0xf]  ;;  %v5759_v26 = vrot.slane %v1911_v1, 5  ;;  %v5762_v31 = vrot.slane %v1894_v4, 4  ;;  %v4167_v4 = vld [vmem:[%s5438_s11 + $0x100] sm:$0xf] }
  0x8b   : > { %4697 = vmatprep.mubr.bf16.mxu1 %v4150_v27  ;;  %v1918_v21 = vrot.slane %v1916_v6, 4  ;;  %v1932_v27 = vrot.slane %v1930_v12, 4  ;;  %v4203_v12 = vld [vmem:[%s5438_s11 + $0x104] sm:$0xf] }
  0x8c   : > { %4704 = vmatpush3.bf16.msra.mxu0 %v5066_v19  ;;  %v5748_v19 = vld [vmem:[%s5438_s11 + $0xc0] sm:$0xf] }
  0x8d   : > { %4728 = vmatpush3.bf16.msra.mxu1 %v5067_v20  ;;  %4705 = vmatprep.subr.bf16.mxu0 %v5068_v29  ;;  %v5750_v20 = vrot.slane %v1897_v54, 5  ;;  %v1922_v38 = vor.u32 %v1921_v22, %v1918_v21  ;;  %v4186_v49 = vcombine.low %v5745_v18, %v5748_v19  ;;  %v4222_v54 = vcombine.low %v5754_v24, %v5757_v25 }
  0x8e   : > { %4729 = vmatprep.subr.bf16.mxu1 %v5069_v32  ;;  %v1991_v19 = vrot.slane %v1989_v13, 5  ;;  %v1914_v22 = vsel %vm5510_vm2, %v5769_v37, %v5759_v26  ;;  %v1997_v24 = vrot.slane %v1995_v14, 5  ;;  %v5085_v26 = vld [vmem:[%s6648_s1 + $0x210] sm:$0xff]  }
  0x8f   : > { %4674 = vmatmul.mubr.bf16.gmra.mxu0 %v4123_v33  ;;  %v4243_v33 = vld [vmem:[%s5438_s11 + $0xd0] sm:$0x1]  ;;  %v5789_v58 = vrot.slane %v1922_v38, 4  ;;  %v1900_v21 = vsel %vm5510_vm2, %v5762_v31, %v5750_v20  ;;  %v5084_v20 = vld [vmem:[%s6648_s1 + $0x218] sm:$0xff]   ;;  %v5086_v31 = vld [vmem:[%s6648_s1 + $0x208] sm:$0xff]  }
  0x90   : > { %4706 = vmatpush3.bf16.msra.mxu0 %v5068_v29  ;;  %4698 = vmatmul.mubr.bf16.gmra.mxu1 %v4151_v36  ;;  %v1939_v29 = vshll.u32 %v4239_v5, 16  ;;  %v4185_v36 = vcombine.low %v5728_v3, %v5732_v10  ;;  %v1967_v60 = vshll.u32 %v4243_v33, 16  ;;  %v4166_v3 = vld [vmem:[%s5438_s11 + $0xe0] sm:$0xf]  ;;  %v5082_v10 = vld [vmem:[%s6648_s1 + $0x228] sm:$0xff]  }
  0x91   : > { %4730 = vmatpush3.bf16.msra.mxu1 %v5069_v32  ;;  %4707 = vmatprep.subr.bf16.mxu0 %v5070_v39  ;;  %v5764_v32 = vrot.slane %v1925_v9, 5  ;;  %v5797_v9 = vld [vmem:[#allocation2 + $0x90] sm:$0xff]  ;;  %v4187_v25 = vcombine.low %v4166_v3, %v4167_v4 }
  0x92   : > { %4731 = vmatprep.subr.bf16.mxu1 %v5071_v40  ;;  %4717 = vmatprep.mubr.bf16.mxu0 %v4184_v41  ;;  %v4245_v41 = vld [vmem:[%s5438_s11 + $0xf0] sm:$0x1]  ;;  %v5787_v55 = vrot.slane %v1939_v29, 5  ;;  %v4223_v29 = vcombine.low %v4202_v11, %v4203_v12 }
  0x93   : > { %4741 = vmatprep.mubr.bf16.mxu1 %v4220_v42  ;;  %v5080_v42 = vld [vmem:[%s6648_s1 + $0x238] sm:$0xff]   ;;  %v1981_v1 = vshll.u32 %v4245_v41, 16 }
  0x94   : > { %4708 = vmatpush3.bf16.msra.mxu0 %v5070_v39  ;;  %v1958_v39 = vshrl.u32 %v4242_v23, 16 }
  0x95   : > { %4732 = vmatpush3.bf16.msra.mxu1 %v5071_v40  ;;  %4709 = vmatprep.subr.bf16.mxu0 %v5072_v43  ;;  %v4244_v40 = vld [vmem:[%s5438_s11 + $0xe0] sm:$0xf]  ;;  %v1983_v18 = vrot.slane %v1981_v1, 5  ;;  %v5101_v1 = vld [vmem:[#allocation3 + $0x48] sm:$0xff]  }
  0x96   : > { %4733 = vmatprep.subr.bf16.mxu1 %v5073_v44  ;;  %v1960_v50 = vrot.slane %v1958_v39, 4  ;;  %v1972_v57 = vshrl.u32 %v4244_v40, 16  ;;  %v1975_v61 = vshll.u32 %v4244_v40, 16 }
  0x98   : > { %4710 = vmatpush3.bf16.msra.mxu0 %v5072_v43  ;;  %v1936_v43 = vor.u32 %v1935_v28, %v1932_v27  ;;  %v1974_v0 = vrot.slane %v1972_v57, 4  ;;  %v1964_v6 = vor.u32 %v1963_v59, %v1960_v50  ;;  %v5083_v27 = vld [vmem:[%s6648_s1 + $0x220] sm:$0xff]   ;;  %v1992_v28 = vor.u32 %v1991_v19, %v1988_v16  ;;  %v5093_v50 = vld [vmem:[#allocation3 + $0x68] sm:$0xff]   ;;  %v5097_v57 = vld [vmem:[#allocation3 + $0x58] sm:$0xff]  }
  0x99   : > { %4734 = vmatpush3.bf16.msra.mxu1 %v5073_v44  ;;  %4711 = vmatprep.subr.bf16.mxu0 %v5074_v45  ;;  %v1946_v44 = vrot.slane %v1944_v34, 4 }
  0x9a   : > { %4735 = vmatprep.subr.bf16.mxu1 %v5075_v46  ;;  %v1965_v23 = vrot.slane %v1964_v6, 4  ;;  %v1993_v34 = vrot.slane %v1992_v28, 4  ;;  %v5103_v6 = vld [vmem:[#allocation3 + $0x40] sm:$0xff]  }
  0x9c   : > { %4712 = vmatpush3.bf16.msra.mxu0 %v5074_v45  ;;  %v1949_v45 = vrot.slane %v1947_v35, 5  ;;  %v5087_v35 = vld [vmem:[%s6648_s1 + $0x200] sm:$0xff]  }
  0x9d   : > { %4736 = vmatpush3.bf16.msra.mxu1 %v5075_v46  ;;  %4713 = vmatprep.subr.bf16.mxu0 %v5076_v53  ;;  %v1953_v46 = vshll.u32 %v4241_v30, 16  ;;  %v4264_v30 = vcombine.low %v1900_v21, %v1914_v22 }
  0x9e   : > { %4737 = vmatprep.subr.bf16.mxu1 %v5077_v62  ;;  %v1950_v56 = vor.u32 %v1949_v45, %v1946_v44  ;;  %v5088_v44 = vld [vmem:[#allocation3 + $0x38] sm:$0xff]  }
  0x9f   : > { %v5793_v63 = vrot.slane %v1953_v46, 5  ;;  %v5089_v45 = vld [vmem:[#allocation3 + $0x78] sm:$0xff]  }
  0xa0   : > { %4714 = vmatpush3.bf16.msra.mxu0 %v5076_v53  ;;  %v5081_v53 = vld [vmem:[%s6648_s1 + $0x230] sm:$0xff]   ;;  %v1951_v5 = vrot.slane %v1950_v56, 4  ;;  %v5096_v56 = vld [vmem:[#allocation3 + $0x18] sm:$0xff]  }
  0xa1   : > { %4738 = vmatpush3.bf16.msra.mxu1 %v5077_v62  ;;  %4715 = vmatprep.subr.bf16.mxu0 %v5078_v2  ;;  %v5791_v62 = vrot.slane %v1936_v43, 4 }
  0xa2   : > { %4739 = vmatprep.subr.bf16.mxu1 %v5079_v15  ;;  %v1956_v38 = vsel %vm5510_vm2, %v1951_v5, %v5793_v63  ;;  %v5102_v5 = vld [vmem:[#allocation3] sm:$0xff]  }
  0xa3   : > { %v1942_v37 = vsel %vm5510_vm2, %v5791_v62, %v5787_v55 }
  0xa4   : > { %4716 = vmatpush3.bf16.msra.mxu0 %v5078_v2  ;;  %v1977_v2 = vrot.slane %v1975_v61, 5  ;;  %v5099_v61 = vld [vmem:[#allocation3 + $0x50] sm:$0xff]  }
  0xa5   : > { %4740 = vmatpush3.bf16.msra.mxu1 %v5079_v15  ;;  %4749 = vmatprep.subr.bf16.mxu0 %v5080_v42  ;;  %v1969_v15 = vrot.slane %v1967_v60, 5  ;;  %v5098_v60 = vld [vmem:[#allocation3 + $0x10] sm:$0xff]  }
  0xa6   : > { %4773 = vmatprep.subr.bf16.mxu1 %v5797_v9  ;;  %v1978_v17 = vor.u32 %v1977_v2, %v1974_v0  ;;  %v5100_v0 = vld [vmem:[#allocation3 + $0x8] sm:$0xff]  }
  0xa7   : > { %4718 = vmatmul.mubr.bf16.vlgmr.msra.gmra.mxu0 %v4185_v36  ;;  %v1928_v36 = vsel %vm5510_vm2, %v5789_v58, %v5764_v32  ;;  %v1970_v39 = vsel %vm5510_vm2, %v1965_v23, %v1969_v15 }
  0xa8   : > { %4750 = vmatpush3.bf16.msra.mxu0 %v5080_v42  ;;  %4742 = vmatmul.mubr.bf16.vlgmr.msra.gmra.mxu1 %v4221_v48  ;;  %v1979_v33 = vrot.slane %v1978_v17, 4  ;;  %v4265_v40 = vcombine.low %v1928_v36, %v1942_v37  ;;  %v4266_v41 = vcombine.low %v1956_v38, %v1970_v39  ;;  %v1998_v42 = vsel %vm5510_vm2, %v1993_v34, %v1997_v24  ;;  %v5091_v48 = vld [vmem:[#allocation3 + $0x70] sm:$0xff]  }
  0xa9   : > { %4751 = vmatprep.subr.bf16.mxu0 %v5081_v53  ;;  %4721 = vmatprep.mubr.bf16.mxu0 %v4186_v49 }
  0xaa   : > { %4745 = vmatprep.mubr.bf16.mxu1 %v4222_v54  ;;  %v1984_v32 = vsel %vm5510_vm2, %v1979_v33, %v1983_v18  ;;  %4774 = vmatpush3.bf16.msra.mxu1 %v5088_v44  ;;  %v4007_v44 = vld [vmem:[%s6649_s2] ss:$0 sm:$0xff] }
  0xab   : > { %v4267_v43 = vcombine.low %v1984_v32, %v1998_v42  ;;  %4775 = vmatprep.subr.bf16.mxu1 %v5797_v9 }
  0xac   : > { %4752 = vmatpush3.bf16.msra.mxu0 %v5081_v53  ;;  %v5095_v53 = vld [vmem:[#allocation3 + $0x60] sm:$0xff]  }
  0xad   : > { %4753 = vmatprep.subr.bf16.mxu0 %v5082_v10 }
  0xae   : > { %4776 = vmatpush3.bf16.msra.mxu1 %v5090_v47 }
  0xaf   : > { %4722 = vmatmul.mubr.bf16.gmra.mxu0 %v4187_v25  ;;  %4777 = vmatprep.subr.bf16.mxu1 %v5797_v9 }
  0xb0   : > { %4754 = vmatpush3.bf16.msra.mxu0 %v5082_v10  ;;  %4746 = vmatmul.mubr.bf16.gmra.mxu1 %v4223_v29 }
  0xb1   : > { %4755 = vmatprep.subr.bf16.mxu0 %v5083_v27  ;;  %4765 = vmatprep.mubr.bf16.mxu0 %v4264_v30 }
  0xb2   : > { %4778 = vmatpush3.bf16.msra.mxu1 %v5092_v7  ;;  %4789 = vmatprep.mubr.msk.bf16.mxu1 %vm5296_vm3, %v5797_v9 }
  0xb3   : > { %4779 = vmatprep.subr.bf16.mxu1 %v5797_v9 }
  0xb4   : > { %4756 = vmatpush3.bf16.msra.mxu0 %v5083_v27 }
  0xb5   : > { %4757 = vmatprep.subr.bf16.mxu0 %v5084_v20 }
  0xb6   : > { %4780 = vmatpush3.bf16.msra.mxu1 %v5094_v52 }
  0xb7   : > { %4781 = vmatprep.subr.bf16.mxu1 %v5797_v9 }
  0xb8   : > { %4758 = vmatpush3.bf16.msra.mxu0 %v5084_v20 }
  0xb9   : > { %4759 = vmatprep.subr.bf16.mxu0 %v5085_v26 }
  0xba   : > { %4782 = vmatpush3.bf16.msra.mxu1 %v5096_v56 }
  0xbb   : > { %4783 = vmatprep.subr.bf16.mxu1 %v5797_v9 }
  0xbc   : > { %4760 = vmatpush3.bf16.msra.mxu0 %v5085_v26 }
  0xbd   : > { %4761 = vmatprep.subr.bf16.mxu0 %v5086_v31 }
  0xbe   : > { %4784 = vmatpush3.bf16.msra.mxu1 %v5098_v60 }
  0xbf   : > { %4785 = vmatprep.subr.bf16.mxu1 %v5797_v9 }
  0xc0   : > { %4762 = vmatpush3.bf16.msra.mxu0 %v5086_v31 }
  0xc1   : > { %4763 = vmatprep.subr.bf16.mxu0 %v5087_v35 }
  0xc2   : > { %4786 = vmatpush3.bf16.msra.mxu1 %v5100_v0 }
  0xc3   : > { %4787 = vmatprep.subr.bf16.mxu1 %v5797_v9 }
  0xc4   : > { %4764 = vmatpush3.bf16.msra.mxu0 %v5087_v35 }
  0xc5   : > { %4793 = vmatprep.subr.bf16.mxu0 %v5797_v9 }
  0xc6   : > { %4788 = vmatpush3.bf16.msra.mxu1 %v5102_v5 }
  0xc7   : > { %4766 = vmatmul.mubr.bf16.vlgmr.msra.gmra.mxu0 %v4265_v40  ;;  %4813 = vmatprep.subr.bf16.mxu1 %v5797_v9 }
  0xc8   : > { %4769 = vmatprep.mubr.bf16.mxu0 %v4266_v41  ;;  %4794 = vmatpush3.bf16.msra.mxu0 %v5089_v45 }
  0xc9   : > { %4795 = vmatprep.subr.bf16.mxu0 %v5797_v9 }
  0xcc   : > { %4796 = vmatpush3.bf16.msra.mxu0 %v5091_v48 }
  0xcd   : > { %4797 = vmatprep.subr.bf16.mxu0 %v5797_v9 }
  0xcf   : > { %4770 = vmatmul.mubr.bf16.gmra.mxu0 %v4267_v43 }
  0xd0   : > { %4798 = vmatpush3.bf16.msra.mxu0 %v5093_v50  ;;  %4809 = vmatprep.mubr.msk.bf16.mxu0 %vm5296_vm3, %v5797_v9  ;;  %v5297_v50 = vmov 1983009808  }
  0xd1   : > { %4799 = vmatprep.subr.bf16.mxu0 %v5797_v9  ;;  %v2236_v52 = vunpack.c.l.s4 %v5297_v50 }
  0xd3   : > { %v2237_v5 = vunpack.c.0.s8 %v2236_v52 }
  0xd4   : > { %4800 = vmatpush3.bf16.msra.mxu0 %v5095_v53  ;;  %v2238_v53 = vlaneseq }
  0xd5   : > { %4801 = vmatprep.subr.bf16.mxu0 %v5797_v9 }
  0xd8   : > { %4802 = vmatpush3.bf16.msra.mxu0 %v5097_v57 }
  0xd9   : > { %4803 = vmatprep.subr.bf16.mxu0 %v5797_v9 }
  0xdc   : > { %4804 = vmatpush3.bf16.msra.mxu0 %v5099_v61 }
  0xdd   : > { %4805 = vmatprep.subr.bf16.mxu0 %v5797_v9 }
  0xe0   : > { %4806 = vmatpush3.bf16.msra.mxu0 %v5101_v1 }
  0xe1   : > { %4807 = vmatprep.subr.bf16.mxu0 %v5797_v9 }
  0xe4   : > { %4808 = vmatpush3.bf16.msra.mxu0 %v5103_v6  ;;  %v2239_v6 = vshrl.u32 %v2238_v53, 7 }
  0xe5   : > { %4833 = vmatprep.subr.bf16.mxu0 %v5797_v9 }
 0x107   : > { %v5846_v46 = vpop.f32.mrf.mxu0 }
 0x108   : > { %v5862_v54 = vpop.f32.mrf.mxu1  ;;  %v447_v48 = vadd.f32 %v5846_v46, %v4007_v44 }
 0x109   : > { %v5850_v49 = vpop.f32.mrf.mxu0 }
 0x10a   : > { %v5870_v59 = vpop.f32.mrf.mxu1  ;;  %v445_v56 = vadd.f32 %v4007_v44, %v5850_v49  ;;  %v617_v60 = vadd.f32 %v5862_v54, %v447_v48 }
 0x10b   : > { %v5854_v51 = vpop.f32.mrf.mxu0 }
 0x10c   : > { %v5876_v63 = vpop.f32.mrf.mxu1  ;;  %v448_v61 = vadd.f32 %v5854_v51, %v4007_v44  ;;  %v615_v46 = vadd.f32 %v5870_v59, %v445_v56  ;;  %v5960_v51 = vsub.s32 %v2237_v5, %v2239_v6 }
 0x10d   : > { %v5864_v55 = vpop.f32.mrf.mxu0 }
 0x10e   : > { %v5882_v4 = vpop.f32.mrf.mxu1  ;;  %v618_v50 = vadd.f32 %v5876_v63, %v448_v61  ;;  %v2241_v61 = vrot.slane %v5797_v9, %v5960_v51 }
 0x10f   : > { %v5868_v58 = vpop.f32.mrf.mxu0 }
 0x110   : > { %v5886_v2 = vpop.f32.mrf.mxu1  ;;  %v451_v49 = vadd.f32 %v5868_v58, %v4007_v44 }
 0x111   : > { %v5874_v62 = vpop.f32.mrf.mxu0 }
 0x112   : > { %v5892_v11 = vpop.f32.mrf.mxu1 }
 0x113   : > { %v5880_v3 = vpop.f32.mrf.mxu0 }
 0x114   : > { %v5894_v13 = vpop.f32.mrf.mxu1  ;;  %v452_v59 = vadd.f32 %v5880_v3, %v4007_v44 }
 0x115   : > { %v5888_v8 = vpop.f32.mrf.mxu0 }
 0x116   : > { %v5896_v15 = vpop.f32.mrf.mxu1 }
 0x127   : > { %v4623_v10 = vpop.f32.mrf.mxu0 }
 0x128   : > { %v4647_v16 = vpop.f32.mrf.mxu1 }
 0x129   : > { %v869_v12 = vpop.f32.mrf.mxu0 }
 0x12a   : > { %v1039_v18 = vpop.f32.mrf.mxu1 }
 0x12b   : > { %v4624_v14 = vpop.f32.mrf.mxu0 }
 0x12c   : > { %v5900_v21 = vpop.f32.mrf.mxu1 }
 0x12d   : > { %v872_v17 = vpop.f32.mrf.mxu0 }
 0x12e   : > { %v5904_v23 = vpop.f32.mrf.mxu1 }
 0x12f   : > { %v5898_v19 = vpop.f32.mrf.mxu0 }
 0x130   : > { %v5908_v25 = vpop.f32.mrf.mxu1 }
 0x131   : > { %v5902_v22 = vpop.f32.mrf.mxu0 }
 0x132   : > { %v5912_v29 = vpop.f32.mrf.mxu1 }
 0x133   : > { %v5906_v24 = vpop.f32.mrf.mxu0 }
 0x134   : > { %v5914_v33 = vpop.f32.mrf.mxu1 }
 0x135   : > { %v5910_v27 = vpop.f32.mrf.mxu0 }
 0x136   : > { %v5916_v20 = vpop.f32.mrf.mxu1 }
 0x147   : > { %v4671_v28 = vpop.f32.mrf.mxu0 }
 0x148   : > { %v4695_v26 = vpop.f32.mrf.mxu1 }
 0x149   : > { %v1209_v30 = vpop.f32.mrf.mxu0 }
 0x14a   : > { %v5920_v35 = vpop.f32.mrf.mxu1 }
 0x14b   : > { %v4672_v34 = vpop.f32.mrf.mxu0 }
 0x14c   : > { %v5924_v37 = vpop.f32.mrf.mxu1 }
 0x14d   : > { %v5918_v31 = vpop.f32.mrf.mxu0 }
 0x14e   : > { %v5928_v39 = vpop.f32.mrf.mxu1 }
 0x14f   : > { %v5922_v36 = vpop.f32.mrf.mxu0 }
 0x150   : > { %v5932_v41 = vpop.f32.mrf.mxu1 }
 0x151   : > { %v5926_v38 = vpop.f32.mrf.mxu0 }
 0x152   : > { %v5936_v43 = vpop.f32.mrf.mxu1 }
 0x153   : > { %v5930_v40 = vpop.f32.mrf.mxu0  ;;  %6660 = vst [vmem:[#allocation13_spill] sm:$0xff] %v5936_v43  ;;  %v900_v43 = vadd.f32 %v869_v12, %v615_v46 }
 0x154   : > { %v5941_v47 = vpop.f32.mrf.mxu1 }
 0x155   : > { %v5934_v32 = vpop.f32.mrf.mxu0  ;;  %6661 = vst [vmem:[#allocation14_spill] sm:$0xff] %v5941_v47  ;;  %v446_v47 = vadd.f32 %v4007_v44, %v5864_v55  ;;  %v621_v55 = vadd.f32 %v5886_v2, %v451_v49  ;;  %v622_v2 = vadd.f32 %v5894_v13, %v452_v59 }
 0x156   : > { %6659 = vst [vmem:[#allocation12_spill] sm:$0xff] %v5934_v32  ;;  %v5947_v57 = vpop.f32.mrf.mxu1  ;;  %v902_v32 = vadd.f32 %v4623_v10, %v617_v60  ;;  %v1070_v10 = vadd.f32 %v1039_v18, %v900_v43 }
 0x157   : > { %6662 = vst [vmem:[#allocation15_spill] sm:$0xff] %v5947_v57  ;;  %v449_v57 = vadd.f32 %v4007_v44, %v5874_v62  ;;  %v616_v52 = vadd.f32 %v5882_v4, %v446_v47  ;;  %v450_v62 = vadd.f32 %v4007_v44, %v5888_v8 }
 0x158   : > { %v1072_v53 = vadd.f32 %v4647_v16, %v902_v32  ;;  %v1240_v3 = vadd.f32 %v1209_v30, %v1070_v10  ;;  %v907_v32 = vadd.f32 %v5906_v24, %v622_v2 }
 0x159   : > { %v901_v63 = vadd.f32 %v872_v17, %v616_v52  ;;  %v619_v58 = vadd.f32 %v5892_v11, %v449_v57  ;;  %v2234_v11 = vcombine.high %v5797_v9, %v5797_v9 }
 0x15a   : > { %v1242_v56 = vadd.f32 %v4671_v28, %v1072_v53  ;;  %v620_v28 = vadd.f32 %v5896_v15, %v450_v62  ;;  %v1077_v47 = vadd.f32 %v5914_v33, %v907_v32  ;;  %v6665_v49 = vld [vmem:[#allocation13_spill] sm:$0xff] }
 0x15b   : > { %v904_v16 = vadd.f32 %v5902_v22, %v619_v58  ;;  %v1071_v8 = vadd.f32 %v5904_v23, %v901_v63  ;;  %v1522_v22 = vadd.f32 %v5920_v35, %v1240_v3  ;;  %v2248_v15 = vrot.slane %v2234_v11, %v5960_v51 }
 0x15c   : > { %v1524_v17 = vadd.f32 %v4695_v26, %v1242_v56  ;;  %v6667_v10 = vld [vmem:[#allocation14_spill] sm:$0xff] }
 0x15d   : > { %v1241_v9 = vadd.f32 %v5918_v31, %v1071_v8  ;;  %v1074_v23 = vadd.f32 %v5912_v29, %v904_v16  ;;  %v6666_v53 = vld [vmem:[#allocation12_spill] sm:$0xff] }
 0x167   : > { %v4719_v42 = vpop.f32.mrf.mxu0 }
 0x168   : > { %v4743_v0 = vpop.f32.mrf.mxu1  ;;  %v1695_v30 = vadd.f32 %v4719_v42, %v1524_v17  ;;  %v1523_v42 = vadd.f32 %v5928_v39, %v1241_v9 }
 0x169   : > { %v1662_v45 = vpop.f32.mrf.mxu0 }
 0x16a   : > { %v1832_v54 = vpop.f32.mrf.mxu1  ;;  %v1693_v44 = vadd.f32 %v1662_v45, %v1522_v22  ;;  %v1865_v29 = vadd.f32 %v4743_v0, %v1695_v30  ;;  %v2502_v45 = vpack.c.bf16 %v2241_v61, %v2241_v61  ;;  %v4276_v30 = vld.sshfl [vmem:[#allocation2 + $0x8] sm:$0x3 pattern:$0x76325410] }
 0x16b   : > { %v5944_v7 = vpop.f32.mrf.mxu0 }
 0x16c   : > { %v4744_v12 = vpop.f32.mrf.mxu1  ;;  %v1863_v33 = vadd.f32 %v1832_v54, %v1693_v44  ;;  %v2550_v62 = vunpack.c.l.b16 %v2502_v45 }
 0x16d   : > { %v5951_v1 = vpop.f32.mrf.mxu0 }
 0x16e   : > { %6663 = vst [vmem:[#allocation16_spill] sm:$0xff] %v5951_v1  ;;  %v903_v1 = vadd.f32 %v4624_v14, %v618_v50  ;;  %v906_v14 = vadd.f32 %v5898_v19, %v621_v55  ;;  %v1835_v43 = vpop.f32.mrf.mxu1  ;;  %v2249_v19 = vcombine.high %v2241_v61, %v2241_v61 }
 0x16f   : > { %v5958_v48 = vpop.f32.mrf.mxu0 }
 0x170   : > { %v1073_v4 = vadd.f32 %v5900_v21, %v903_v1  ;;  %v1076_v13 = vadd.f32 %v5908_v25, %v906_v14  ;;  %v1244_v25 = vadd.f32 %v5926_v38, %v1074_v23  ;;  %v4747_v35 = vpop.f32.mrf.mxu1  ;;  %v2503_v31 = vpack.c.bf16 %v2249_v19, %v2249_v19 }
 0x171   : > { %v1678_v60 = vpop.f32.mrf.mxu0 }
 0x172   : > { %v1243_v18 = vadd.f32 %v4672_v34, %v1073_v4  ;;  %v905_v34 = vadd.f32 %v5910_v27, %v620_v28  ;;  %v1246_v26 = vadd.f32 %v5922_v36, %v1076_v13  ;;  %v2250_v36 = vcombine.high %v2248_v15, %v2248_v15  ;;  %v1848_v0 = vpop.f32.mrf.mxu1 }
 0x173   : > { %v4724_v21 = vpop.f32.mrf.mxu0  ;;  %v1526_v52 = vadd.f32 %v6665_v49, %v1244_v25  ;;  %v6000_v55 = vunpack.c.l.b16 %v2503_v31  ;;  %v2832_v31 = vpack.c.bf16 %v4276_v30, %v4276_v30 }
 0x174   : > { %v1525_v24 = vadd.f32 %v5924_v37, %v1243_v18  ;;  %v1075_v1 = vadd.f32 %v5916_v20, %v905_v34  ;;  %v1247_v37 = vadd.f32 %v5930_v40, %v1077_v47  ;;  %v1528_v6 = vadd.f32 %v5932_v41, %v1246_v26  ;;  %v4748_v2 = vpop.f32.mrf.mxu1 }
 0x175   : > { %v1681_v57 = vpop.f32.mrf.mxu0  ;;  %v6664_v46 = vld [vmem:[#allocation16_spill] sm:$0xff]  ;;  %v2505_v58 = vpack.c.bf16 %v2250_v36, %v2250_v36  ;;  %v1697_v4 = vadd.f32 %v1678_v60, %v1526_v52  ;;  %v2566_v8 = vrot.slane %v6000_v55, 7 }
 0x176   : > { %v1696_v27 = vadd.f32 %v5944_v7, %v1525_v24  ;;  %v1694_v38 = vadd.f32 %v6664_v46, %v1523_v42  ;;  %v1245_v39 = vadd.f32 %v6666_v53, %v1075_v1  ;;  %v2504_v7 = vpack.c.bf16 %v2248_v15, %v2248_v15  ;;  %v1851_v23 = vpop.f32.mrf.mxu1 }
 0x177   : > { %v1699_v40 = vadd.f32 %v5958_v48, %v1528_v6  ;;  %v1529_v63 = vadd.f32 %v6667_v10, %v1247_v37  ;;  %v6668_v48 = vld [vmem:[#allocation15_spill] sm:$0xff]  ;;  %v1867_v19 = vadd.f32 %v1848_v0, %v1697_v4  ;;  %v2553_v15 = vunpack.c.l.b16 %v2505_v58 }
 0x178   : > { %v1866_v20 = vadd.f32 %v4744_v12, %v1696_v27  ;;  %v1864_v61 = vadd.f32 %v1835_v43, %v1694_v38  ;;  %v1527_v3 = vadd.f32 %v6668_v48, %v1245_v39  ;;  %v2552_v11 = vunpack.c.l.b16 %v2504_v7 }
 0x179   : > { %v1869_v17 = vadd.f32 %v4747_v35, %v1699_v40  ;;  %v1700_v18 = vadd.f32 %v4724_v21, %v1529_v63  ;;  %v2711_v43 = vrot.slane %v2550_v62, 1  ;;  %v2568_v21 = vsel %vm2567_vm4, %v2566_v8, %v2550_v62 }
 0x17a   : > { %v1698_v13 = vadd.f32 %v1681_v57, %v1527_v3  ;;  %v2569_v24 = vrot.slane %v2552_v11, 6  ;;  %v2713_v25 = vrot.slane %v2552_v11, 7  ;;  %v2715_v36 = vrot.slane %v2553_v15, 6 }
 0x17b   : > { %v1870_v26 = vadd.f32 %v4748_v2, %v1700_v18  ;;  %v2712_v57 = vsel %vm2567_vm4, %v6000_v55, %v2711_v43  ;;  %v6020_v38 = vunpack.c.l.b16 %v2832_v31 }
 0x17c   : > { %v1868_v42 = vadd.f32 %v1851_v23, %v1698_v13  ;;  %v2571_v37 = vsel %vm2570_vm5, %v2569_v24, %v2568_v21  ;;  %v2861_v53 = vsel %vm2567_vm4, %v2713_v25, %v6000_v55 }
 0x17d   : > { %v6035_v55 = vsel %vm2570_vm5, %v2715_v36, %v2861_v53 }
 0x187   : > { %v4767_v5 = vpop.f32.mrf.mxu0 }
 0x188   : > { %v2147_v50 = vadd.f32 %v4767_v5, %v1865_v29  ;;  %v2572_v5 = vrot.slane %v2553_v15, 5 }
 0x189   : > { %v2114_v59 = vpop.f32.mrf.mxu0 }
 0x18a   : > { %2155 = vst [vmem:[%s6003_s13 + $0x10] sm:$0xff] %v2147_v50  ;;  %v2183_v41 = vmax.f32 %v2147_v50, 0.0  ;;  %v2145_v54 = vadd.f32 %v2114_v59, %v1863_v33  ;;  %v2714_v33 = vsel %vm2570_vm5, %v2713_v25, %v2712_v57  ;;  %v2574_v59 = vsel %vm2573_vm6, %v2572_v5, %v2571_v37 }
 0x18b   : > { %v4768_v56 = vpop.f32.mrf.mxu0  ;;  %v2716_v7 = vsel %vm2573_vm6, %v2715_v36, %v2714_v33 }
 0x18c   : > { %2192 = vst [vmem:[#allocation2 + $0x31] sm:$0xff] %v2183_v41  ;;  %2153 = vst [vmem:[%s6003_s13] sm:$0xff] %v2145_v54  ;;  %v2181_v12 = vmax.f32 %v2145_v54, 0.0  ;;  %v2148_v14 = vadd.f32 %v4768_v56, %v1866_v20  ;;  %v2863_v56 = vrot.slane %v6020_v38, 5 }
 0x18d   : > { %v2117_v16 = vpop.f32.mrf.mxu0 }
 0x18e   : > { %2190 = vst [vmem:[#allocation2 + $0x11] sm:$0xff] %v2181_v12  ;;  %2156 = vst [vmem:[%s6003_s13 + $0x18] sm:$0xff] %v2148_v14  ;;  %v2184_v28 = vmax.f32 %v2148_v14, 0.0  ;;  %v2146_v32 = vadd.f32 %v2117_v16, %v1864_v61 }
 0x18f   : > { %v4771_v60 = vpop.f32.mrf.mxu0 }
 0x190   : > { %2193 = vst [vmem:[#allocation2 + $0x41] sm:$0xff] %v2184_v28  ;;  %2154 = vst [vmem:[%s6003_s13 + $0x8] sm:$0xff] %v2146_v32  ;;  %v2182_v22 = vmax.f32 %v2146_v32, 0.0  ;;  %v2151_v9 = vadd.f32 %v4771_v60, %v1869_v17 }
 0x191   : > { %v2130_v34 = vpop.f32.mrf.mxu0 }
 0x192   : > { %2191 = vst [vmem:[#allocation2 + $0x21] sm:$0xff] %v2182_v22  ;;  %2159 = vst [vmem:[%s6003_s13 + $0x30] sm:$0xff] %v2151_v9  ;;  %v2187_v44 = vmax.f32 %v2151_v9, 0.0  ;;  %v2149_v47 = vadd.f32 %v2130_v34, %v1867_v19 }
 0x193   : > { %v4772_v35 = vpop.f32.mrf.mxu0  ;;  %v6026_v39 = vld [vmem:[#allocation2 + $0x30] sm:$0xff] }
 0x194   : > { %2196 = vst [vmem:[#allocation2 + $0x71] sm:$0xff] %v2187_v44  ;;  %2157 = vst [vmem:[%s6003_s13 + $0x20] sm:$0xff] %v2149_v47  ;;  %v2185_v29 = vmax.f32 %v2149_v47, 0.0  ;;  %v2152_v27 = vadd.f32 %v4772_v35, %v1870_v26  ;;  %v2306_v58 = vcombine.high %v6026_v39, %v6026_v39  ;;  %v6045_v2 = vrot.slane %v6026_v39, %v5960_v51 }
 0x195   : > { %v2133_v1 = vpop.f32.mrf.mxu0  ;;  %v6032_v10 = vld [vmem:[#allocation2 + $0x10] sm:$0xff] }
 0x196   : > { %2194 = vst [vmem:[#allocation2 + $0x51] sm:$0xff] %v2185_v29  ;;  %2160 = vst [vmem:[%s6003_s13 + $0x38] sm:$0xff] %v2152_v27  ;;  %v2188_v45 = vmax.f32 %v2152_v27, 0.0  ;;  %v2150_v6 = vadd.f32 %v2133_v1, %v1868_v42  ;;  %v2258_v3 = vcombine.high %v6032_v10, %v6032_v10  ;;  %v6055_v60 = vrot.slane %v6032_v10, %v5960_v51 }
 0x197   : > { %v2206_v46 = vld [vmem:[#allocation2 + $0x40] sm:$0xff]  ;;  %v6071_v47 = vld.sshfl [vmem:[#allocation2 + $0x48] sm:$0x3 pattern:$0x76325410]  ;;  %v6151_v38 = vrot.slane %v2306_v58, %v5960_v51 }
 0x198   : > { %2197 = vst [vmem:[#allocation2 + $0x81] sm:$0xff] %v2188_v45  ;;  %2158 = vst [vmem:[%s6003_s13 + $0x28] sm:$0xff] %v2150_v6  ;;  %v2186_v50 = vmax.f32 %v2150_v6, 0.0  ;;  %v2330_v49 = vcombine.high %v2206_v46, %v2206_v46  ;;  %v2337_v52 = vrot.slane %v2206_v46, %v5960_v51  ;;  %v2834_v45 = vpack.c.bf16 %v6071_v47, %v6071_v47 }
 0x199   : > { %v2202_v0 = vld [vmem:[#allocation2 + $0x20] sm:$0xff] }
 0x19a   : > { %2195 = vst [vmem:[#allocation2 + $0x61] sm:$0xff] %v2186_v50  ;;  %v2282_v20 = vcombine.high %v2202_v0, %v2202_v0  ;;  %v2289_v40 = vrot.slane %v2202_v0, %v5960_v51  ;;  %v2344_v41 = vrot.slane %v2330_v49, %v5960_v51  ;;  %v2345_v54 = vcombine.high %v2337_v52, %v2337_v52 }
 0x19b   : > { %v2510_v63 = vpack.c.bf16 %v2337_v52, %v2337_v52  ;;  %v6165_v58 = vunpack.c.l.b16 %v2834_v45 }
 0x19c   : > { %v2296_v62 = vrot.slane %v2282_v20, %v5960_v51  ;;  %v2297_v61 = vcombine.high %v2289_v40, %v2289_v40  ;;  %v2346_v4 = vcombine.high %v2344_v41, %v2344_v41  ;;  %v2506_v12 = vpack.c.bf16 %v2289_v40, %v2289_v40 }
 0x19d   : > { %v2511_v14 = vpack.c.bf16 %v2345_v54, %v2345_v54  ;;  %v2512_v48 = vpack.c.bf16 %v2344_v41, %v2344_v41  ;;  %v6061_v22 = vunpack.c.l.b16 %v2510_v63 }
 0x19e   : > { %v2298_v16 = vcombine.high %v2296_v62, %v2296_v62  ;;  %v2507_v11 = vpack.c.bf16 %v2297_v61, %v2297_v61  ;;  %v2508_v8 = vpack.c.bf16 %v2296_v62, %v2296_v62  ;;  %v2513_v17 = vpack.c.bf16 %v2346_v4, %v2346_v4 }
 0x19f   : > { %v6047_v18 = vunpack.c.l.b16 %v2506_v12  ;;  %v6049_v28 = vunpack.c.l.b16 %v2511_v14  ;;  %v6051_v32 = vunpack.c.l.b16 %v2512_v48  ;;  %v2725_v36 = vrot.slane %v6061_v22, 1 }
 0x1a0   : > { %v2509_v43 = vpack.c.bf16 %v2298_v16, %v2298_v16  ;;  %v6057_v19 = vunpack.c.l.b16 %v2507_v11  ;;  %v6059_v13 = vunpack.c.l.b16 %v2508_v8  ;;  %v6063_v30 = vunpack.c.l.b16 %v2513_v17 }
 0x1a1   : > { %v2210_v9 = vld [vmem:[#allocation2 + $0x60] sm:$0xff]  ;;  %v2575_v23 = vrot.slane %v6047_v18, 4  ;;  %v2587_v34 = vrot.slane %v6049_v28, 7  ;;  %v2589_v15 = vrot.slane %v6051_v32, 6  ;;  %v2717_v44 = vrot.slane %v6047_v18, 5 }
 0x1a2   : > { %v2378_v21 = vcombine.high %v2210_v9, %v2210_v9  ;;  %v2385_v24 = vrot.slane %v2210_v9, %v5960_v51  ;;  %v2578_v26 = vrot.slane %v6057_v19, 3  ;;  %v6073_v25 = vunpack.c.l.b16 %v2509_v43  ;;  %v4282_v39 = vld.sshfl [vmem:[#allocation2 + $0x68] sm:$0x3 pattern:$0x76325410] }
 0x1a3   : > { %v2577_v35 = vsel %vm2576_vm7, %v2575_v23, %v2574_v59  ;;  %v2581_v57 = vrot.slane %v6059_v13, 2  ;;  %v2588_v31 = vsel %vm2567_vm4, %v2587_v34, %v6061_v22  ;;  %v2591_v5 = vrot.slane %v6063_v30, 5 }
 0x1a4   : > { %v2392_v42 = vrot.slane %v2378_v21, %v5960_v51  ;;  %v2393_v29 = vcombine.high %v2385_v24, %v2385_v24  ;;  %v2514_v27 = vpack.c.bf16 %v2385_v24, %v2385_v24  ;;  %v2580_v1 = vsel %vm2579_vm8, %v2578_v26, %v2577_v35  ;;  %v6121_v26 = vld.sshfl [vmem:[#allocation2 + $0x38] sm:$0x3 pattern:$0x76325410] }
 0x1a5   : > { %v2590_v37 = vsel %vm2570_vm5, %v2589_v15, %v2588_v31  ;;  %v2583_v49 = vsel %vm2582_vm9, %v2581_v57, %v2580_v1  ;;  %v2584_v52 = vrot.slane %v6073_v25, 1  ;;  %v2718_v53 = vsel %vm2576_vm7, %v2717_v44, %v2716_v7  ;;  %v5107_v31 = vld [vmem:[#allocation3 + $0xb8] sm:$0xff]  }
 0x1a6   : > { %v2394_v6 = vcombine.high %v2392_v42, %v2392_v42  ;;  %v2515_v33 = vpack.c.bf16 %v2393_v29, %v2393_v29  ;;  %v2516_v46 = vpack.c.bf16 %v2392_v42, %v2392_v42  ;;  %v6086_v50 = vunpack.c.l.b16 %v2514_v27 }
 0x1a7   : > { %v2719_v0 = vrot.slane %v6057_v19, 4  ;;  %v2592_v54 = vsel %vm2573_vm6, %v2591_v5, %v2590_v37  ;;  %v2721_v63 = vrot.slane %v6059_v13, 3  ;;  %v2726_v62 = vsel %vm2567_vm4, %v6049_v28, %v2725_v36  ;;  %v6142_v37 = vld.sshfl [vmem:[#allocation2 + $0x18] sm:$0x3 pattern:$0x76325410] }
 0x1a8   : > { %v2517_v59 = vpack.c.bf16 %v2394_v6, %v2394_v6  ;;  %v6092_v20 = vunpack.c.l.b16 %v2515_v33  ;;  %v6094_v40 = vunpack.c.l.b16 %v2516_v46  ;;  %v2593_v41 = vrot.slane %v6086_v50, 4  ;;  %v4278_v36 = vld.sshfl [vmem:[#allocation2 + $0x28] sm:$0x3 pattern:$0x76325410]  ;;  %v2208_v6 = vld [vmem:[#allocation2 + $0x50] sm:$0xff] }
 0x1a9   : > { %v2727_v61 = vrot.slane %v6051_v32, 7  ;;  %v2720_v48 = vsel %vm2579_vm8, %v2719_v0, %v2718_v53  ;;  %v2729_v11 = vrot.slane %v6063_v30, 6  ;;  %v2731_v8 = vrot.slane %v6086_v50, 5  ;;  %v5108_v33 = vld [vmem:[#allocation3 + $0xf8] sm:$0xff]   ;;  %v6169_v53 = vld [vmem:[#allocation2 + $0x90] sm:$0xff] }
 0x1aa   : > { %v6102_v4 = vunpack.c.l.b16 %v2517_v59  ;;  %v2594_v7 = vsel %vm2576_vm7, %v2593_v41, %v2592_v54  ;;  %v2595_v12 = vrot.slane %v6092_v20, 3  ;;  %v2597_v14 = vrot.slane %v6094_v40, 2  ;;  %v2212_v59 = vld [vmem:[#allocation2 + $0x70] sm:$0xff] }
 0x1ab   : > { %v2728_v16 = vsel %vm2570_vm5, %v2727_v61, %v2726_v62  ;;  %v2723_v9 = vrot.slane %v6073_v25, 2  ;;  %v2733_v23 = vrot.slane %v6092_v20, 4  ;;  %v2735_v21 = vrot.slane %v6094_v40, 3 }
 0x1ac   : > { %v2596_v17 = vsel %vm2579_vm8, %v2595_v12, %v2594_v7  ;;  %v2599_v43 = vrot.slane %v6102_v4, 1  ;;  %v2730_v15 = vsel %vm2573_vm6, %v2729_v11, %v2728_v16  ;;  %v2737_v24 = vrot.slane %v6102_v4, 2 }
 0x1ad   : > { %v2598_v34 = vsel %vm2582_vm9, %v2597_v14, %v2596_v17  ;;  %v2586_v44 = vsel %vm2585_vm10, %v2584_v52, %v2583_v49  ;;  %v2722_v35 = vsel %vm2582_vm9, %v2721_v63, %v2720_v48  ;;  %v2732_v57 = vsel %vm2576_vm7, %v2731_v8, %v2730_v15  ;;  %v5109_v52 = vld [vmem:[#allocation3 + $0xb0] sm:$0xff]  }
 0x1ae   : > { %v2600_v47 = vsel %vm2585_vm10, %v2599_v43, %v2598_v34  ;;  %v2734_v29 = vsel %vm2579_vm8, %v2733_v23, %v2732_v57  ;;  %v2864_v27 = vsel %vm2573_vm6, %v2863_v56, %v6035_v55  ;;  %v6140_v1 = vrot.slane %v2258_v3, %v5960_v51  ;;  %v5110_v8 = vld [vmem:[#allocation3 + $0xf0] sm:$0xff]  }
 0x1af   : > { %v2601_v42 = vpack.c.b16 %v2600_v47, %v2586_v44  ;;  %v2736_v5 = vsel %vm2582_vm9, %v2735_v21, %v2734_v29  ;;  %v6155_v55 = vcombine.high %v6045_v2, %v6045_v2  ;;  %v3297_v10 = vpack.c.bf16 %v6121_v26, %v6121_v26 }
 0x1b0   : > { %v2724_v56 = vsel %vm2585_vm10, %v2723_v9, %v2722_v35  ;;  %v2738_v3 = vsel %vm2585_vm10, %v2737_v24, %v2736_v5  ;;  %v2870_v46 = vsel %vm2567_vm4, %v2727_v61, %v6049_v28  ;;  %v2273_v41 = vcombine.high %v6055_v60, %v6055_v60 }
 0x1b1   : > { %4790 = vmatmul.mubr.bf16.vlgmr.msra.gmra.mxu1 %v2601_v42  ;;  %v2739_v49 = vpack.c.b16 %v2738_v3, %v2724_v56  ;;  %v2976_v54 = vpack.c.bf16 %v6045_v2, %v6045_v2  ;;  %v2833_v45 = vpack.c.bf16 %v4278_v36, %v4278_v36  ;;  %v2274_v62 = vcombine.high %v6140_v1, %v6140_v1  ;;  %v5112_v36 = vld [vmem:[#allocation3 + $0xe8] sm:$0xff]  }
 0x1b2   : > { %4814 = vmatpush3.bf16.msra.mxu1 %v5107_v31  ;;  %4829 = vmatprep.mubr.msk.bf16.mxu1 %vm5296_vm3, %v6169_v53  ;;  %v2354_v61 = vcombine.high %v2208_v6, %v2208_v6  ;;  %v6181_v7 = vrot.slane %v2208_v6, %v5960_v51  ;;  %v2835_v12 = vpack.c.bf16 %v4282_v39, %v4282_v39  ;;  %v2872_v17 = vrot.slane %v6165_v58, 5  ;;  %v5113_v39 = vld [vmem:[#allocation3 + $0xa0] sm:$0xff]  }
 0x1b3   : > { %4815 = vmatprep.subr.bf16.mxu1 %v6169_v53  ;;  %4810 = vmatmul.mubr.bf16.vlgmr.msra.gmra.mxu0 %v2739_v49  ;;  %v2865_v14 = vsel %vm2576_vm7, %v2719_v0, %v2864_v27  ;;  %v2871_v48 = vsel %vm2570_vm5, %v2729_v11, %v2870_v46  ;;  %v3296_v16 = vpack.c.bf16 %v6142_v37, %v6142_v37  ;;  %v5111_v0 = vld [vmem:[#allocation3 + $0xa8] sm:$0xff]   ;;  %v6200_v35 = vunpack.c.l.b16 %v2833_v45  ;;  %v5127_v37 = vld [vmem:[#allocation3 + $0x138] sm:$0xff]  }
 0x1b4   : > { %4834 = vmatpush3.bf16.msra.mxu0 %v5108_v33  ;;  %4849 = vmatprep.mubr.msk.bf16.mxu0 %vm5296_vm3, %v6169_v53  ;;  %v2368_v43 = vrot.slane %v2354_v61, %v5960_v51  ;;  %v2369_v34 = vcombine.high %v6181_v7, %v6181_v7  ;;  %v2409_v15 = vrot.slane %v2212_v59, %v5960_v51  ;;  %v6203_v29 = vunpack.c.l.b16 %v2835_v12 }
 0x1b5   : > { %4835 = vmatprep.subr.bf16.mxu0 %v6169_v53  ;;  %v2402_v11 = vcombine.high %v2212_v59, %v2212_v59  ;;  %v2973_v44 = vpack.c.bf16 %v2273_v41, %v2273_v41  ;;  %v2974_v47 = vpack.c.bf16 %v6140_v1, %v6140_v1  ;;  %v2873_v57 = vsel %vm2573_vm6, %v2872_v17, %v2871_v48 }
 0x1b6   : > { %4816 = vmatpush3.bf16.msra.mxu1 %v5109_v52  ;;  %v2370_v31 = vcombine.high %v2368_v43, %v2368_v43  ;;  %v2975_v42 = vpack.c.bf16 %v2274_v62, %v2274_v62  ;;  %v2866_v27 = vsel %vm2579_vm8, %v2721_v63, %v2865_v14  ;;  %v2874_v5 = vsel %vm2576_vm7, %v2733_v23, %v2873_v57  ;;  %v5114_v14 = vld [vmem:[#allocation3 + $0xe0] sm:$0xff]  }
 0x1b7   : > { %4817 = vmatprep.subr.bf16.mxu1 %v6169_v53  ;;  %v2972_v1 = vpack.c.bf16 %v6055_v60, %v6055_v60  ;;  %v2417_v6 = vcombine.high %v2409_v15, %v2409_v15  ;;  %v2981_v56 = vpack.c.bf16 %v2369_v34, %v2369_v34  ;;  %v2982_v3 = vpack.c.bf16 %v2368_v43, %v2368_v43  ;;  %v5115_v43 = vld [vmem:[#allocation3 + $0x98] sm:$0xff]  }
 0x1b8   : > { %4836 = vmatpush3.bf16.msra.mxu0 %v5110_v8  ;;  %v2983_v33 = vpack.c.bf16 %v2370_v31, %v2370_v31  ;;  %v6216_v63 = vcombine.high %v6151_v38, %v6151_v38  ;;  %v2416_v46 = vrot.slane %v2402_v11, %v5960_v51  ;;  %v6219_v23 = vunpack.c.l.b16 %v2973_v44 }
 0x1b9   : > { %4837 = vmatprep.subr.bf16.mxu0 %v6169_v53  ;;  %v6221_v49 = vunpack.c.l.b16 %v2974_v47  ;;  %v6227_v60 = vsel %vm2582_vm9, %v2723_v9, %v2866_v27  ;;  %v2868_v52 = vrot.slane %v6200_v35, 1  ;;  %v2984_v59 = vpack.c.bf16 %v2409_v15, %v2409_v15  ;;  %v5116_v27 = vld [vmem:[#allocation3 + $0xd8] sm:$0xff]  }
 0x1ba   : > { %4818 = vmatpush3.bf16.msra.mxu1 %v5111_v0  ;;  %v6230_v41 = vunpack.c.l.b16 %v2975_v42  ;;  %v2875_v45 = vsel %vm2579_vm8, %v2735_v21, %v2874_v5  ;;  %v2877_v62 = vrot.slane %v6203_v29, 1  ;;  %v2980_v61 = vpack.c.bf16 %v6181_v7, %v6181_v7 }
 0x1bb   : > { %4819 = vmatprep.subr.bf16.mxu1 %v6169_v53  ;;  %v6238_v12 = vunpack.c.l.b16 %v2981_v56  ;;  %v2985_v9 = vpack.c.bf16 %v2417_v6, %v2417_v6  ;;  %v3021_v48 = vunpack.c.l.b16 %v2972_v1  ;;  %v6240_v8 = vunpack.c.l.b16 %v2982_v3 }
 0x1bc   : > { %4838 = vmatpush3.bf16.msra.mxu0 %v5112_v36  ;;  %v6242_v17 = vunpack.c.l.b16 %v2983_v33  ;;  %v2418_v21 = vcombine.high %v2416_v46, %v2416_v46  ;;  %v2977_v34 = vpack.c.bf16 %v6155_v55, %v6155_v55  ;;  %v3037_v7 = vrot.slane %v6219_v23, 7  ;;  %v5117_v36 = vld [vmem:[#allocation3 + $0x90] sm:$0xff]  }
 0x1bd   : > { %4839 = vmatprep.subr.bf16.mxu0 %v6169_v53  ;;  %v3039_v15 = vrot.slane %v6221_v49, 6  ;;  %v2986_v0 = vpack.c.bf16 %v2416_v46, %v2416_v46  ;;  %v6253_v11 = vunpack.c.l.b16 %v2976_v54  ;;  %v6255_v44 = vunpack.c.l.b16 %v2984_v59 }
 0x1be   : > { %4820 = vmatpush3.bf16.msra.mxu1 %v5113_v39  ;;  %v3041_v47 = vrot.slane %v6230_v41, 5  ;;  %v3029_v57 = vunpack.c.l.b16 %v2980_v61  ;;  %v3038_v31 = vsel %vm2567_vm4, %v3037_v7, %v3021_v48  ;;  %v3051_v55 = vrot.slane %v6238_v12, 7 }
 0x1bf   : > { %4821 = vmatprep.subr.bf16.mxu1 %v6169_v53  ;;  %v3053_v42 = vrot.slane %v6240_v8, 6  ;;  %v2978_v5 = vpack.c.bf16 %v6151_v38, %v6151_v38  ;;  %v6263_v1 = vunpack.c.l.b16 %v2985_v9  ;;  %v3040_v2 = vsel %vm2570_vm5, %v3039_v15, %v3038_v31  ;;  %v5119_v15 = vld [vmem:[#allocation3 + $0x88] sm:$0xff]  }
 0x1c0   : > { %4840 = vmatpush3.bf16.msra.mxu0 %v5114_v14  ;;  %v3055_v54 = vrot.slane %v6242_v17, 5  ;;  %v2979_v6 = vpack.c.bf16 %v6216_v63, %v6216_v63  ;;  %v2987_v56 = vpack.c.bf16 %v2418_v21, %v2418_v21  ;;  %v6270_v3 = vunpack.c.l.b16 %v2977_v34 }
 0x1c1   : > { %4841 = vmatprep.subr.bf16.mxu0 %v6169_v53  ;;  %v3052_v33 = vsel %vm2567_vm4, %v3051_v55, %v3029_v57  ;;  %v3042_v38 = vsel %vm2573_vm6, %v3041_v47, %v3040_v2  ;;  %v3057_v46 = vrot.slane %v6255_v44, 4  ;;  %v3175_v59 = vrot.slane %v3021_v48, 1 }
 0x1c2   : > { %4822 = vmatpush3.bf16.msra.mxu1 %v5115_v43  ;;  %v3054_v39 = vsel %vm2570_vm5, %v3053_v42, %v3052_v33  ;;  %v6277_v61 = vunpack.c.l.b16 %v2986_v0  ;;  %v3043_v14 = vrot.slane %v6253_v11, 4  ;;  %v3177_v9 = vrot.slane %v6221_v49, 7  ;;  %v5118_v43 = vld [vmem:[#allocation3 + $0xd0] sm:$0xff]  }
 0x1c3   : > { %4823 = vmatprep.subr.bf16.mxu1 %v6169_v53  ;;  %v3056_v63 = vsel %vm2573_vm6, %v3055_v54, %v3054_v39  ;;  %v2876_v21 = vsel %vm2582_vm9, %v2737_v24, %v2875_v45  ;;  %v3059_v7 = vrot.slane %v6263_v1, 3  ;;  %v3176_v48 = vsel %vm2567_vm4, %v6219_v23, %v3175_v59  ;;  %v4281_v24 = vld.sshfl [vmem:[#allocation2 + $0x58] sm:$0x3 pattern:$0x76325410] }
 0x1c4   : > { %4842 = vmatpush3.bf16.msra.mxu0 %v5116_v27  ;;  %v3058_v34 = vsel %vm2576_vm7, %v3057_v46, %v3056_v63  ;;  %v6290_v0 = vunpack.c.l.b16 %v2978_v5  ;;  %v6292_v49 = vunpack.c.l.b16 %v2979_v6  ;;  %v6294_v47 = vunpack.c.l.b16 %v2987_v56  ;;  %v5120_v6 = vld [vmem:[#allocation3 + $0xc8] sm:$0xff]  }
 0x1c5   : > { %4843 = vmatprep.subr.bf16.mxu0 %v6169_v53  ;;  %v3044_v31 = vsel %vm2576_vm7, %v3043_v14, %v3042_v38  ;;  %v3045_v45 = vrot.slane %v6270_v3, 3  ;;  %v3060_v55 = vsel %vm2579_vm8, %v3059_v7, %v3058_v34  ;;  %v3179_v42 = vrot.slane %v6230_v41, 6  ;;  %v5122_v34 = vld [vmem:[#allocation3 + $0xc0] sm:$0xff]  }
 0x1c6   : > { %4824 = vmatpush3.bf16.msra.mxu1 %v5117_v36  ;;  %v3189_v27 = vrot.slane %v3029_v57, 1  ;;  %v3061_v2 = vrot.slane %v6277_v61, 2  ;;  %v3178_v5 = vsel %vm2570_vm5, %v3177_v9, %v3176_v48  ;;  %v3191_v54 = vrot.slane %v6240_v8, 7  ;;  %v5121_v8 = vld [vmem:[#allocation3 + $0x80] sm:$0xff]  }
 0x1c7   : > { %4825 = vmatprep.subr.bf16.mxu1 %v6169_v53  ;;  %v3193_v36 = vrot.slane %v6242_v17, 6  ;;  %v2869_v56 = vsel %vm2585_vm10, %v2868_v52, %v6227_v60  ;;  %v2878_v41 = vsel %vm2585_vm10, %v2877_v62, %v2876_v21  ;;  %v3046_v57 = vsel %vm2579_vm8, %v3045_v45, %v3044_v31 }
 0x1c8   : > { %4844 = vmatpush3.bf16.msra.mxu0 %v5118_v43  ;;  %v3190_v33 = vsel %vm2567_vm4, %v6238_v12, %v3189_v27  ;;  %v3047_v17 = vrot.slane %v6290_v0, 2  ;;  %v3049_v38 = vrot.slane %v6292_v49, 1  ;;  %v3062_v39 = vsel %vm2582_vm9, %v3061_v2, %v3060_v55  ;;  %v6344_v2 = vld.sshfl [vmem:[#allocation2 + $0x78] sm:$0x3 pattern:$0x76325410] }
 0x1c9   : > { %4845 = vmatprep.subr.bf16.mxu0 %v6169_v53  ;;  %v3192_v60 = vsel %vm2570_vm5, %v3191_v54, %v3190_v33  ;;  %v3063_v52 = vrot.slane %v6294_v47, 1  ;;  %v3180_v62 = vsel %vm2573_vm6, %v3179_v42, %v3178_v5  ;;  %v3298_v59 = vpack.c.bf16 %v4281_v24, %v4281_v24  ;;  %v2214_v24 = vld [vmem:[#allocation2 + $0x80] sm:$0xff] }
 0x1ca   : > { %4826 = vmatpush3.bf16.msra.mxu1 %v5119_v15  ;;  %v3194_v46 = vsel %vm2573_vm6, %v3193_v36, %v3192_v60  ;;  %v3048_v14 = vsel %vm2582_vm9, %v3047_v17, %v3046_v57  ;;  %v3181_v63 = vrot.slane %v6253_v11, 5  ;;  %v3195_v43 = vrot.slane %v6255_v44, 5 }
 0x1cb   : > { %4827 = vmatprep.subr.bf16.mxu1 %v6169_v53  ;;  %v3321_v21 = vunpack.c.l.b16 %v3296_v16  ;;  %v3064_v7 = vsel %vm2585_vm10, %v3063_v52, %v3062_v39  ;;  %v3323_v48 = vunpack.c.l.b16 %v3298_v59  ;;  %v3325_v15 = vsel %vm2567_vm4, %v3177_v9, %v6219_v23 }
 0x1cc   : > { %4846 = vmatpush3.bf16.msra.mxu0 %v5120_v6  ;;  %v3334_v31 = vsel %vm2567_vm4, %v3191_v54, %v6238_v12  ;;  %v2879_v11 = vpack.c.b16 %v2878_v41, %v2869_v56  ;;  %v3746_v44 = vrot.slane %v6200_v35, 5  ;;  %v3182_v16 = vsel %vm2576_vm7, %v3181_v63, %v3180_v62  ;;  %v5128_v56 = vld [vmem:[#allocation3 + $0x178] sm:$0xff]   ;;  %v5130_v63 = vld [vmem:[#allocation3 + $0x170] sm:$0xff]  }
 0x1cd   : > { %4847 = vmatprep.subr.bf16.mxu0 %v6169_v53  ;;  %v3196_v45 = vsel %vm2576_vm7, %v3195_v43, %v3194_v46  ;;  %v3050_v55 = vsel %vm2585_vm10, %v3049_v38, %v3048_v14  ;;  %v3183_v23 = vrot.slane %v6270_v3, 4  ;;  %v3197_v12 = vrot.slane %v6263_v1, 4 }
 0x1ce   : > { %4828 = vmatpush3.bf16.msra.mxu1 %v5121_v8  ;;  %v3326_v9 = vsel %vm2570_vm5, %v3179_v42, %v3325_v15  ;;  %v3065_v27 = vpack.c.b16 %v3064_v7, %v3050_v55  ;;  %v3327_v5 = vrot.slane %v3321_v21, 5  ;;  %v3335_v54 = vsel %vm2570_vm5, %v3193_v36, %v3334_v31  ;;  %v5129_v42 = vld [vmem:[#allocation3 + $0x130] sm:$0xff]   ;;  %v5131_v7 = vld [vmem:[#allocation3 + $0x128] sm:$0xff]  }
 0x1cf   : > { %4853 = vmatprep.subr.bf16.mxu1 %v6169_v53  ;;  %v2426_v6 = vcombine.high %v2214_v24, %v2214_v24  ;;  %v6348_v41 = vsel %vm2579_vm8, %v3183_v23, %v3182_v16  ;;  %v3198_v57 = vsel %vm2579_vm8, %v3197_v12, %v3196_v45  ;;  %v3336_v3 = vrot.slane %v3323_v48, 5 }
 0x1d0   : > { %4848 = vmatpush3.bf16.msra.mxu0 %v5122_v34  ;;  %v2433_v1 = vrot.slane %v2214_v24, %v5960_v51  ;;  %v3199_v33 = vrot.slane %v6277_v61, 3  ;;  %v3328_v36 = vsel %vm2573_vm6, %v3327_v5, %v3326_v9  ;;  %v3465_v17 = vrot.slane %v6057_v19, 7 }
 0x1d1   : > { %4830 = vmatmul.mubr.bf16.vlgmr.msra.gmra.mxu1 %v2879_v11  ;;  %4873 = vmatprep.subr.bf16.mxu0 %v6169_v53  ;;  %v2440_v8 = vrot.slane %v2426_v6, %v5960_v51  ;;  %v3299_v38 = vpack.c.bf16 %v6344_v2, %v6344_v2  ;;  %v3337_v39 = vsel %vm2573_vm6, %v3336_v3, %v3335_v54  ;;  %v3467_v52 = vrot.slane %v6059_v13, 6 }
 0x1d2   : > { %4854 = vmatpush3.bf16.msra.mxu1 %v5127_v37  ;;  %4869 = vmatprep.mubr.msk.bf16.mxu1 %vm5296_vm3, %v6169_v53  ;;  %v2441_v60 = vcombine.high %v2433_v1, %v2433_v1  ;;  %v6367_v51 = vsel %vm2582_vm9, %v3199_v33, %v3198_v57  ;;  %v3436_v46 = vpack.c.bf16 %v2433_v1, %v2433_v1  ;;  %v3469_v59 = vrot.slane %v6073_v25, 5  ;;  %v5133_v57 = vld [vmem:[#allocation3 + $0x120] sm:$0xff]  }
 0x1d3   : > { %4855 = vmatprep.subr.bf16.mxu1 %v6169_v53  ;;  %4850 = vmatmul.mubr.bf16.vlgmr.msra.gmra.mxu0 %v3065_v27  ;;  %v2442_v62 = vcombine.high %v2440_v8, %v2440_v8  ;;  %v3755_v14 = vrot.slane %v6203_v29, 5  ;;  %v6374_v43 = vsel %vm2576_vm7, %v3183_v23, %v3328_v36  ;;  %v3438_v34 = vpack.c.bf16 %v2440_v8, %v2440_v8  ;;  %v5132_v27 = vld [vmem:[#allocation3 + $0x168] sm:$0xff]  }
 0x1d4   : > { %4874 = vmatpush3.bf16.msra.mxu0 %v5128_v56  ;;  %4889 = vmatprep.mubr.msk.bf16.mxu0 %vm5296_vm3, %v6169_v53  ;;  %v3437_v21 = vpack.c.bf16 %v2441_v60, %v2441_v60  ;;  %v6378_v48 = vsel %vm2576_vm7, %v3197_v12, %v3337_v39  ;;  %v6380_v31 = vunpack.c.l.b16 %v3436_v46  ;;  %v3466_v24 = vsel %vm2567_vm4, %v3465_v17, %v6047_v18 }
 0x1d5   : > { %4875 = vmatprep.subr.bf16.mxu0 %v6169_v53  ;;  %v3439_v15 = vpack.c.bf16 %v2442_v62, %v2442_v62  ;;  %v6387_v37 = vunpack.c.l.b16 %v3438_v34  ;;  %v3468_v16 = vsel %vm2570_vm5, %v3467_v52, %v3466_v24  ;;  %v3471_v45 = vrot.slane %v6061_v22, 4 }
 0x1d6   : > { %4856 = vmatpush3.bf16.msra.mxu1 %v5129_v42  ;;  %v6385_v11 = vunpack.c.l.b16 %v3437_v21  ;;  %v3470_v23 = vsel %vm2573_vm6, %v3469_v59, %v3468_v16  ;;  %v3473_v12 = vrot.slane %v6049_v28, 3  ;;  %v3475_v9 = vrot.slane %v6051_v32, 2 }
 0x1d7   : > { %4857 = vmatprep.subr.bf16.mxu1 %v6169_v53  ;;  %v6391_v55 = vunpack.c.l.b16 %v3439_v15  ;;  %v3472_v5 = vsel %vm2576_vm7, %v3471_v45, %v3470_v23  ;;  %v3479_v54 = vrot.slane %v6092_v20, 7  ;;  %v3481_v6 = vrot.slane %v6094_v40, 6  ;;  %v5135_v15 = vld [vmem:[#allocation3 + $0x118] sm:$0xff]  }
 0x1d8   : > { %4876 = vmatpush3.bf16.msra.mxu0 %v5130_v63  ;;  %v3483_v56 = vrot.slane %v6102_v4, 5  ;;  %v3474_v3 = vsel %vm2579_vm8, %v3473_v12, %v3472_v5  ;;  %v3477_v1 = vrot.slane %v6063_v30, 1  ;;  %v3485_v42 = vrot.slane %v6380_v31, 4  ;;  %v5134_v63 = vld [vmem:[#allocation3 + $0x160] sm:$0xff]  }
 0x1d9   : > { %4877 = vmatprep.subr.bf16.mxu0 %v6169_v53  ;;  %v3487_v36 = vrot.slane %v6385_v11, 3  ;;  %v3476_v8 = vsel %vm2582_vm9, %v3475_v9, %v3474_v3  ;;  %v3480_v17 = vsel %vm2567_vm4, %v3479_v54, %v6086_v50  ;;  %v3489_v39 = vrot.slane %v6387_v37, 2  ;;  %v4284_v54 = vld.sshfl [vmem:[#allocation2 + $0x88] sm:$0x3 pattern:$0x76325410] }
 0x1da   : > { %4858 = vmatpush3.bf16.msra.mxu1 %v5131_v7  ;;  %v3603_v60 = vrot.slane %v6047_v18, 1  ;;  %v6412_v52 = vsel %vm2585_vm10, %v3477_v1, %v3476_v8  ;;  %v3482_v62 = vsel %vm2570_vm5, %v3481_v6, %v3480_v17  ;;  %v3605_v46 = vrot.slane %v6059_v13, 7 }
 0x1db   : > { %4859 = vmatprep.subr.bf16.mxu1 %v6169_v53  ;;  %v3607_v59 = vrot.slane %v6073_v25, 6  ;;  %v3484_v21 = vsel %vm2573_vm6, %v3483_v56, %v3482_v62  ;;  %v3491_v34 = vrot.slane %v6391_v55, 1  ;;  %v3609_v18 = vrot.slane %v6061_v22, 5  ;;  %v5138_v62 = vld [vmem:[#allocation3 + $0x150] sm:$0xff]  }
 0x1dc   : > { %4878 = vmatpush3.bf16.msra.mxu0 %v5132_v27  ;;  %v3604_v7 = vsel %vm2567_vm4, %v6057_v19, %v3603_v60  ;;  %v3486_v24 = vsel %vm2576_vm7, %v3485_v42, %v3484_v21  ;;  %v3611_v25 = vrot.slane %v6049_v28, 4  ;;  %v3613_v16 = vrot.slane %v6051_v32, 3  ;;  %v5136_v32 = vld [vmem:[#allocation3 + $0x158] sm:$0xff]  }
 0x1dd   : > { %4879 = vmatprep.subr.bf16.mxu0 %v6169_v53  ;;  %v3606_v13 = vsel %vm2570_vm5, %v3605_v46, %v3604_v7  ;;  %v3488_v45 = vsel %vm2579_vm8, %v3487_v36, %v3486_v24  ;;  %v3617_v22 = vrot.slane %v6086_v50, 1  ;;  %v3619_v12 = vrot.slane %v6094_v40, 7  ;;  %v5139_v7 = vld [vmem:[#allocation3 + $0x108] sm:$0xff]  }
 0x1de   : > { %4860 = vmatpush3.bf16.msra.mxu1 %v5133_v57  ;;  %v3608_v23 = vsel %vm2573_vm6, %v3607_v59, %v3606_v13  ;;  %v3490_v9 = vsel %vm2582_vm9, %v3489_v39, %v3488_v45  ;;  %v3615_v5 = vrot.slane %v6063_v30, 2  ;;  %v3621_v28 = vrot.slane %v6102_v4, 6  ;;  %v5137_v57 = vld [vmem:[#allocation3 + $0x110] sm:$0xff]  }
 0x1df   : > { %4861 = vmatprep.subr.bf16.mxu1 %v6169_v53  ;;  %v3610_v27 = vsel %vm2576_vm7, %v3609_v18, %v3608_v23  ;;  %v6437_v6 = vsel %vm2585_vm10, %v3491_v34, %v3490_v9  ;;  %v3618_v50 = vsel %vm2567_vm4, %v6092_v20, %v3617_v22  ;;  %v3623_v40 = vrot.slane %v6380_v31, 5 }
 0x1e0   : > { %4880 = vmatpush3.bf16.msra.mxu0 %v5134_v63  ;;  %v3612_v56 = vsel %vm2579_vm8, %v3611_v25, %v3610_v27  ;;  %v3493_v30 = vpack.c.b16 %v6437_v6, %v6412_v52  ;;  %v3620_v3 = vsel %vm2570_vm5, %v3619_v12, %v3618_v50  ;;  %v3625_v1 = vrot.slane %v6385_v11, 4  ;;  %v5142_v27 = vld [vmem:[#allocation3 + $0x140] sm:$0xff]   ;;  %v5146_v50 = vld [vmem:[#allocation3 + $0x1f0] sm:$0xff]   ;;  %v5164_v52 = vld [vmem:[#allocation3 + $0x218] sm:$0xff]  }
 0x1e1   : > { %4881 = vmatprep.subr.bf16.mxu0 %v6169_v53  ;;  %v3614_v4 = vsel %vm2582_vm9, %v3613_v16, %v3612_v56  ;;  %v3622_v31 = vsel %vm2573_vm6, %v3621_v28, %v3620_v3  ;;  %v3627_v36 = vrot.slane %v6387_v37, 3  ;;  %v3724_v8 = vpack.c.bf16 %v4284_v54, %v4284_v54  ;;  %v5144_v54 = vld [vmem:[#allocation3 + $0x1f8] sm:$0xff]   ;;  %v5145_v56 = vld [vmem:[#allocation3 + $0x1b0] sm:$0xff]   ;;  %v5150_v3 = vld [vmem:[#allocation3 + $0x1e0] sm:$0xff]  }
 0x1e2   : > { %4862 = vmatpush3.bf16.msra.mxu1 %v5135_v15  ;;  %v6451_v42 = vsel %vm2585_vm10, %v3615_v5, %v3614_v4  ;;  %v3624_v17 = vsel %vm2576_vm7, %v3623_v40, %v3622_v31  ;;  %v3629_v39 = vrot.slane %v6391_v55, 2  ;;  %v3744_v60 = vsel %vm2567_vm4, %v3605_v46, %v6057_v19  ;;  %v5147_v40 = vld [vmem:[#allocation3 + $0x1a8] sm:$0xff]   ;;  %v5149_v4 = vld [vmem:[#allocation3 + $0x1a0] sm:$0xff]   ;;  %v5152_v31 = vld [vmem:[#allocation3 + $0x1d8] sm:$0xff]  }
 0x1e3   : > { %4863 = vmatprep.subr.bf16.mxu1 %v6169_v53  ;;  %v3753_v11 = vsel %vm2567_vm4, %v3619_v12, %v6092_v20  ;;  %v3626_v63 = vsel %vm2579_vm8, %v3625_v1, %v3624_v17  ;;  %v3743_v21 = vunpack.c.l.b16 %v3724_v8  ;;  %v3745_v34 = vsel %vm2570_vm5, %v3607_v59, %v3744_v60  ;;  %v5154_v8 = vld [vmem:[#allocation3 + $0x1d0] sm:$0xff]   ;;  %v5155_v17 = vld [vmem:[#allocation3 + $0x188] sm:$0xff]   ;;  %v5157_v60 = vld [vmem:[#allocation3 + $0x180] sm:$0xff]  }
 0x1e4   : > { %4882 = vmatpush3.bf16.msra.mxu0 %v5136_v32  ;;  %v3754_v37 = vsel %vm2570_vm5, %v3621_v28, %v3753_v11  ;;  %v3185_v55 = vrot.slane %v6290_v0, 3  ;;  %v3628_v19 = vsel %vm2582_vm9, %v3627_v36, %v3626_v63  ;;  %v3747_v20 = vsel %vm2573_vm6, %v3746_v44, %v3745_v34  ;;  %v5158_v11 = vld [vmem:[#allocation3 + $0x1c0] sm:$0xff]   ;;  %v5161_v63 = vld [vmem:[#allocation3 + $0x230] sm:$0xff]  }
 0x1e5   : > { %4883 = vmatprep.subr.bf16.mxu0 %v6169_v53  ;;  %v3756_v46 = vsel %vm2573_vm6, %v3755_v14, %v3754_v37  ;;  %v6475_v59 = vsel %vm2585_vm10, %v3629_v39, %v3628_v19  ;;  %v3748_v18 = vsel %vm2576_vm7, %v3611_v25, %v3747_v20  ;;  %v3751_v15 = vrot.slane %v6165_v58, 1  ;;  %v5140_v14 = vld [vmem:[#allocation3 + $0x148] sm:$0xff]   ;;  %v5163_v34 = vld [vmem:[#allocation3 + $0x220] sm:$0xff]   ;;  %v5165_v6 = vld [vmem:[#allocation3 + $0x210] sm:$0xff]  }
 0x1e6   : > { %4864 = vmatpush3.bf16.msra.mxu1 %v5137_v57  ;;  %v3757_v0 = vsel %vm2576_vm7, %v3625_v1, %v3756_v46  ;;  %v3631_v35 = vpack.c.b16 %v6475_v59, %v6451_v42  ;;  %v3749_v44 = vsel %vm2579_vm8, %v3613_v16, %v3748_v18  ;;  %v3760_v24 = vrot.slane %v3743_v21, 1  ;;  %v5141_v16 = vld [vmem:[#allocation3 + $0x100] sm:$0xff]   ;;  %v5148_v57 = vld [vmem:[#allocation3 + $0x1e8] sm:$0xff]   ;;  %v5151_v1 = vld [vmem:[#allocation3 + $0x198] sm:$0xff]  }
 0x1e7   : > { %4865 = vmatprep.subr.bf16.mxu1 %v6169_v53  ;;  %v3758_v29 = vsel %vm2579_vm8, %v3627_v36, %v3757_v0  ;;  %v3324_v13 = vunpack.c.l.b16 %v3299_v38  ;;  %v3339_v58 = vsel %vm2579_vm8, %v3199_v33, %v6378_v48  ;;  %v3750_v25 = vsel %vm2582_vm9, %v3615_v5, %v3749_v44  ;;  %v5153_v36 = vld [vmem:[#allocation3 + $0x190] sm:$0xff]   ;;  %v5162_v21 = vld [vmem:[#allocation3 + $0x228] sm:$0xff]   ;;  %v5167_v42 = vld [vmem:[#allocation3 + $0x200] sm:$0xff]  }
 0x1e8   : > { %4884 = vmatpush3.bf16.msra.mxu0 %v5138_v62  ;;  %v3759_v45 = vsel %vm2582_vm9, %v3629_v39, %v3758_v29  ;;  %v3201_v23 = vrot.slane %v6294_v47, 2  ;;  %v6496_v22 = vsel %vm2585_vm10, %v3751_v15, %v3750_v25  ;;  %v3186_v61 = vsel %vm2582_vm9, %v3185_v55, %v6348_v41  ;;  %v5156_v39 = vld [vmem:[#allocation3 + $0x1c8] sm:$0xff]   ;;  %v5160_v62 = vld [vmem:[#allocation3 + $0x238] sm:$0xff]   ;;  %v4285_v37 = vld [vmem:[%s6651_s4] ss:$0 sm:$0xff] }
 0x1e9   : > { %4885 = vmatprep.subr.bf16.mxu0 %v6169_v53  ;;  %v6499_v2 = vsel %vm2585_vm10, %v3760_v24, %v3759_v45  ;;  %v3322_v33 = vunpack.c.l.b16 %v3297_v10  ;;  %v3330_v38 = vsel %vm2579_vm8, %v3185_v55, %v6374_v43  ;;  %v3187_v48 = vrot.slane %v6292_v49, 2  ;;  %v5143_v43 = vld [vmem:[#allocation3 + $0x1b8] sm:$0xff]  }
 0x1ea   : > { %4866 = vmatpush3.bf16.msra.mxu1 %v5139_v7  ;;  %v3762_v47 = vpack.c.b16 %v6499_v2, %v6496_v22  ;;  %v3202_v12 = vsel %vm2585_vm10, %v3201_v23, %v6367_v51  ;;  %v3340_v9 = vsel %vm2582_vm9, %v3201_v23, %v3339_v58  ;;  %v3341_v41 = vrot.slane %v3324_v13, 1 }
 0x1eb   : > { %4867 = vmatprep.subr.bf16.mxu1 %v6169_v53  ;;  %v3188_v26 = vsel %vm2585_vm10, %v3187_v48, %v3186_v61  ;;  %v3331_v10 = vsel %vm2582_vm9, %v3187_v48, %v3330_v38  ;;  %v3332_v28 = vrot.slane %v3322_v33, 1 }
 0x1ec   : > { %4886 = vmatpush3.bf16.msra.mxu0 %v5140_v14  ;;  %v3203_v5 = vpack.c.b16 %v3202_v12, %v3188_v26  ;;  %v3342_v49 = vsel %vm2585_vm10, %v3341_v41, %v3340_v9 }
 0x1ed   : > { %4887 = vmatprep.subr.bf16.mxu0 %v6169_v53  ;;  %v3333_v51 = vsel %vm2585_vm10, %v3332_v28, %v3331_v10 }
 0x1ee   : > { %4868 = vmatpush3.bf16.msra.mxu1 %v5141_v16  ;;  %v3343_v32 = vpack.c.b16 %v3342_v49, %v3333_v51 }
 0x1ef   : > { %4893 = vmatprep.subr.bf16.mxu1 %v6169_v53 }
 0x1f0   : > { %4888 = vmatpush3.bf16.msra.mxu0 %v5142_v27 }
 0x1f1   : > { %4870 = vmatmul.mubr.bf16.vlgmr.msra.gmra.mxu1 %v3203_v5  ;;  %4913 = vmatprep.subr.bf16.mxu0 %v6169_v53 }
 0x1f2   : > { %4894 = vmatpush3.bf16.msra.mxu1 %v5143_v43  ;;  %4909 = vmatprep.mubr.msk.bf16.mxu1 %vm5296_vm3, %v6169_v53 }
 0x1f3   : > { %4895 = vmatprep.subr.bf16.mxu1 %v6169_v53  ;;  %4890 = vmatmul.mubr.bf16.vlgmr.msra.gmra.mxu0 %v3343_v32 }
 0x1f4   : > { %4914 = vmatpush3.bf16.msra.mxu0 %v5144_v54  ;;  %4929 = vmatprep.mubr.msk.bf16.mxu0 %vm5296_vm3, %v6169_v53 }
 0x1f5   : > { %4915 = vmatprep.subr.bf16.mxu0 %v6169_v53 }
 0x1f6   : > { %4896 = vmatpush3.bf16.msra.mxu1 %v5145_v56 }
 0x1f7   : > { %4897 = vmatprep.subr.bf16.mxu1 %v6169_v53 }
 0x1f8   : > { %4916 = vmatpush3.bf16.msra.mxu0 %v5146_v50 }
 0x1f9   : > { %4917 = vmatprep.subr.bf16.mxu0 %v6169_v53 }
 0x1fa   : > { %4898 = vmatpush3.bf16.msra.mxu1 %v5147_v40 }
 0x1fb   : > { %4899 = vmatprep.subr.bf16.mxu1 %v6169_v53 }
 0x1fc   : > { %4918 = vmatpush3.bf16.msra.mxu0 %v5148_v57 }
 0x1fd   : > { %4919 = vmatprep.subr.bf16.mxu0 %v6169_v53 }
 0x1fe   : > { %4900 = vmatpush3.bf16.msra.mxu1 %v5149_v4 }
 0x1ff   : > { %4901 = vmatprep.subr.bf16.mxu1 %v6169_v53 }
 0x200   : > { %4920 = vmatpush3.bf16.msra.mxu0 %v5150_v3 }
 0x201   : > { %4921 = vmatprep.subr.bf16.mxu0 %v6169_v53 }
 0x202   : > { %4902 = vmatpush3.bf16.msra.mxu1 %v5151_v1 }
 0x203   : > { %4903 = vmatprep.subr.bf16.mxu1 %v6169_v53 }
 0x204   : > { %4922 = vmatpush3.bf16.msra.mxu0 %v5152_v31 }
 0x205   : > { %4923 = vmatprep.subr.bf16.mxu0 %v6169_v53 }
 0x206   : > { %4904 = vmatpush3.bf16.msra.mxu1 %v5153_v36 }
 0x207   : > { %4905 = vmatprep.subr.bf16.mxu1 %v6169_v53 }
 0x208   : > { %4924 = vmatpush3.bf16.msra.mxu0 %v5154_v8 }
 0x209   : > { %4925 = vmatprep.subr.bf16.mxu0 %v6169_v53 }
 0x20a   : > { %4906 = vmatpush3.bf16.msra.mxu1 %v5155_v17 }
 0x20b   : > { %4907 = vmatprep.subr.bf16.mxu1 %v6169_v53 }
 0x20c   : > { %4926 = vmatpush3.bf16.msra.mxu0 %v5156_v39 }
 0x20d   : > { %4927 = vmatprep.subr.bf16.mxu0 %v6169_v53 }
 0x20e   : > { %4908 = vmatpush3.bf16.msra.mxu1 %v5157_v60 }
 0x20f   : > { %4933 = vmatprep.subr.bf16.mxu1 %v6169_v53 }
 0x210   : > { %4928 = vmatpush3.bf16.msra.mxu0 %v5158_v11 }
 0x211   : > { %4910 = vmatmul.mubr.bf16.vlgmr.msra.gmra.mxu1 %v3493_v30  ;;  %v5166_v30 = vld [vmem:[#allocation3 + $0x208] sm:$0xff]  }
 0x212   : > { %4934 = vmatpush3.bf16.msra.mxu1 %v5160_v62  ;;  %4949 = vmatprep.mubr.msk.bf16.mxu1 %vm5296_vm3, %v6169_v53 }
 0x213   : > { %4935 = vmatprep.subr.bf16.mxu1 %v6169_v53  ;;  %4930 = vmatmul.mubr.bf16.vlgmr.msra.gmra.mxu0 %v3631_v35 }
 0x216   : > { %4936 = vmatpush3.bf16.msra.mxu1 %v5161_v63 }
 0x217   : > { %4937 = vmatprep.subr.bf16.mxu1 %v6169_v53 }
 0x21a   : > { %4938 = vmatpush3.bf16.msra.mxu1 %v5162_v21 }
 0x21b   : > { %4939 = vmatprep.subr.bf16.mxu1 %v6169_v53 }
 0x21e   : > { %4940 = vmatpush3.bf16.msra.mxu1 %v5163_v34 }
 0x21f   : > { %4941 = vmatprep.subr.bf16.mxu1 %v6169_v53 }
 0x222   : > { %4942 = vmatpush3.bf16.msra.mxu1 %v5164_v52 }
 0x223   : > { %4943 = vmatprep.subr.bf16.mxu1 %v6169_v53 }
 0x226   : > { %4944 = vmatpush3.bf16.msra.mxu1 %v5165_v6 }
 0x227   : > { %4945 = vmatprep.subr.bf16.mxu1 %v6169_v53 }
 0x22a   : > { %4946 = vmatpush3.bf16.msra.mxu1 %v5166_v30 }
 0x22b   : > { %4947 = vmatprep.subr.bf16.mxu1 %v6169_v53 }
 0x22e   : > { %4948 = vmatpush3.bf16.msra.mxu1 %v5167_v42 }
 0x231   : > { %4950 = vmatmul.mubr.bf16.vlgmr.msra.gmra.mxu1 %v3762_v47 }
 0x271   : > { %v2685_v7 = vpop.f32.mrf.mxu1 }
 0x272   : > { %v2692_v55 = vadd.f32 %v4285_v37, %v2685_v7 }
 0x273   : > { %v4791_v19 = vpop.f32.mrf.mxu1  ;;  %v2823_v20 = vpop.f32.mrf.mxu0 }
 0x274   : > { %v2830_v46 = vadd.f32 %v2823_v20, %v2692_v55 }
 0x275   : > { %v2688_v59 = vpop.f32.mrf.mxu1  ;;  %v4811_v53 = vpop.f32.mrf.mxu0 }
 0x276   : > { %v2693_v18 = vadd.f32 %v4285_v37, %v2688_v59 }
 0x277   : > { %v4792_v15 = vpop.f32.mrf.mxu1  ;;  %v2826_v0 = vpop.f32.mrf.mxu0 }
 0x278   : > { %v2831_v35 = vadd.f32 %v2826_v0, %v2693_v18 }
 0x279   : > { %v4812_v44 = vpop.f32.mrf.mxu0 }
 0x27a   : > { %5209 = shalt.err (!%p5206_p0)
}
 0x27b   : > { %s5210_s12 = scalar_lea.hbm %s6569_s19, 1024  ;;  %s5214_s14 = scalar_lea.hbm %s6652_s5, 2048 }
 0x27c   : > { %p5211_p1 = scmp.ne.s32.totalorder %s6569_s19, %s5210_s12  ;;  %p5215_p4 = scmp.lt.s32.totalorder %s6569_s19, %s6652_s5 }
 0x27d   : > { %p5216_p7 = scmp.lt.s32.totalorder %s5214_s14, %s5210_s12 }
 0x27e   : > { %p5212_p2 = pnand %p5211_p1, %p5375_p5 }
 0x27f   : > { %p5217_p6 = por %p5216_p7, %p5215_p4 }
 0x280   : > { %p5213_p3 = pneg %p5212_p2 }
 0x282   : > { %p5218_p8 = pnand %p5217_p6, %p5213_p3 }
 0x284   : > { %5221 = shalt.err (!%p5218_p8)
}
 0x285   : > { %s5299_s18 = smov 128   ;;  %s5300_s26 = smov 8  }
 0x286   : > { %4958 = dma.vmem_to_hbm [thread:$0]  (%p5375_p5), %s6563_s15, 1024, %s6569_s19, %s3858_s20, %s5299_s18, %s5299_s18, %s5300_s26  }
 0x287   : > { %s4005_s15 = sshll.u32 %s5979_s10, 4  ;;  %s4367_s28 = sshll.u32 %s5358_s25, 8 }
 0x288   : > { %s270_s19 = scalar_lea.vmem [#allocation7], %s4005_s15  ;;  %s6604_s12 = scalar_lea.hbm %s6653_s6, %s4367_s28 }
 0x289   : > { %s3892_s20 = sshll.u32 %s270_s19, 4  ;;  %s3863_s13 = scalar_lea.sflag [#allocation8], %s5979_s10  ;;  %s6599_s20 = int_to_ptr.vmem [resolvable:$true] %s3892_s20 }
 0x28a   : > { %s5222_s11 = scalar_lea.vmem %s6599_s20, 256  ;;  %s5301_s25 = smov [#allocation7]  }
 0x28b   : > { %p5223_p9 = scmp.ne.s32.totalorder %s6599_s20, %s5222_s11  ;;  %s5226_s14 = sshll.u32 %s5301_s25, 4  ;;  %s5227_s14 = int_to_ptr.vmem [resolvable:$false] %s5226_s14 }
 0x28c   : > { %s5228_s16 = scalar_lea.vmem %s5227_s14, 512  ;;  %p5229_p12 = scmp.lt.s32.totalorder %s6599_s20, %s5227_s14 }
 0x28d   : > { %p5224_p10 = pnand %p5223_p9, %p5375_p5  ;;  %p5230_p13 = scmp.lt.s32.totalorder %s5228_s16, %s5222_s11 }
 0x28f   : > { %p5225_p11 = pneg %p5224_p10  ;;  %p5231_p0 = por %p5230_p13, %p5229_p12 }
 0x291   : > { %v2963_v29 = vpop.f32.mrf.mxu1  ;;  %p5232_p1 = pnand %p5231_p0, %p5225_p11 }
 0x292   : > { %v2970_v24 = vadd.f32 %v2963_v29, %v2830_v46 }
 0x293   : > { %v4831_v14 = vpop.f32.mrf.mxu1  ;;  %v3149_v13 = vpop.f32.mrf.mxu0 }
 0x294   : > { %v3156_v58 = vadd.f32 %v3149_v13, %v2970_v24 }
 0x295   : > { %v2966_v25 = vpop.f32.mrf.mxu1  ;;  %v4851_v45 = vpop.f32.mrf.mxu0 }
 0x296   : > { %v2971_v16 = vadd.f32 %v2966_v25, %v2831_v35 }
 0x297   : > { %v4832_v23 = vpop.f32.mrf.mxu1  ;;  %v3152_v22 = vpop.f32.mrf.mxu0 }
 0x298   : > { %v3157_v2 = vadd.f32 %v3152_v22, %v2971_v16 }
 0x299   : > { %v4852_v61 = vpop.f32.mrf.mxu0 }
 0x2b1   : > { %v3287_v33 = vpop.f32.mrf.mxu1 }
 0x2b2   : > { %v3294_v32 = vadd.f32 %v3287_v33, %v3156_v58 }
 0x2b3   : > { %v4871_v38 = vpop.f32.mrf.mxu1  ;;  %v3427_v47 = vpop.f32.mrf.mxu0 }
 0x2b4   : > { %v3434_v56 = vadd.f32 %v3427_v47, %v3294_v32 }
 0x2b5   : > { %v3290_v48 = vpop.f32.mrf.mxu1  ;;  %v4891_v12 = vpop.f32.mrf.mxu0 }
 0x2b6   : > { %v3295_v50 = vadd.f32 %v3290_v48, %v3157_v2 }
 0x2b7   : > { %v4872_v9 = vpop.f32.mrf.mxu1  ;;  %v3430_v27 = vpop.f32.mrf.mxu0 }
 0x2b8   : > { %v3435_v57 = vadd.f32 %v3430_v27, %v3295_v50 }
 0x2b9   : > { %v4892_v41 = vpop.f32.mrf.mxu0 }
 0x2d1   : > { %v3577_v26 = vpop.f32.mrf.mxu1 }
 0x2d2   : > { %v3584_v40 = vadd.f32 %v3577_v26, %v3434_v56 }
 0x2d3   : > { %v4911_v10 = vpop.f32.mrf.mxu1  ;;  %v3715_v43 = vpop.f32.mrf.mxu0 }
 0x2d4   : > { %v3722_v4 = vadd.f32 %v3715_v43, %v3584_v40 }
 0x2d5   : > { %v3580_v5 = vpop.f32.mrf.mxu1  ;;  %v4931_v28 = vpop.f32.mrf.mxu0 }
 0x2d6   : > { %v3585_v3 = vadd.f32 %v3580_v5, %v3435_v57 }
 0x2d7   : > { %v4912_v49 = vpop.f32.mrf.mxu1  ;;  %v3718_v51 = vpop.f32.mrf.mxu0 }
 0x2d8   : > { %v3723_v8 = vadd.f32 %v3718_v51, %v3585_v3 }
 0x2d9   : > { %v4932_v54 = vpop.f32.mrf.mxu0 }
 0x2f1   : > { %v3846_v1 = vpop.f32.mrf.mxu1 }
 0x2f2   : > { %v3853_v31 = vadd.f32 %v3846_v1, %v3722_v4 }
 0x2f3   : > { %v4951_v36 = vpop.f32.mrf.mxu1 }
 0x2f4   : > { %3855 = vst [vmem:[%s270_s19] sm:$0xff] %v3853_v31 }
 0x2f5   : > { %v3849_v17 = vpop.f32.mrf.mxu1 }
 0x2f6   : > { %v3854_v39 = vadd.f32 %v3849_v17, %v3723_v8 }
 0x2f7   : > { %v4952_v60 = vpop.f32.mrf.mxu1 }
 0x2f8   : > { %3856 = vst [vmem:[%s270_s19 + $0x8] sm:$0xff] %v3854_v39 }
 0x2f9   : > { %5235 = shalt.err (!%p5232_p1)
}
 0x2fa   : > { %s5236_s17 = scalar_lea.hbm %s6604_s12, 256  ;;  %s5240_s19 = scalar_lea.hbm %s6653_s6, 512 }
 0x2fb   : > { %p5237_p2 = scmp.ne.s32.totalorder %s6604_s12, %s5236_s17  ;;  %p5241_p7 = scmp.lt.s32.totalorder %s6604_s12, %s6653_s6 }
 0x2fc   : > { %p5242_p6 = scmp.lt.s32.totalorder %s5240_s19, %s5236_s17 }
 0x2fd   : > { %p5238_p3 = pnand %p5237_p2, %p5375_p5 }
 0x2fe   : > { %p5243_p8 = por %p5242_p6, %p5241_p7 }
 0x2ff   : > { %p5239_p4 = pneg %p5238_p3 }
 0x301   : > { %p5244_p9 = pnand %p5243_p8, %p5239_p4 }
 0x303   : > { %5247 = shalt.err (!%p5244_p9)
}
 0x304   : > { %4959 = dma.vmem_to_hbm [thread:$0]  (%p5375_p5), %s6599_s20, 256, %s6604_s12, %s3863_s13, %s5299_s18, %s5299_s18, %s5300_s26  }
 0x305 PF: > { %p4975_p10 = scmp.ge.s32.totalorder %s5290_s24, 2  ;;  %s3907_s9 = sand.u32 1, %s5278_s21  }
 0x306   : > { %p6669_p11 = scmp.ne.s32.totalorder %s6655_s8, 0  ;;  %s3908_s11 = scalar_lea.sflag [#allocation5], %s3907_s9 }
 0x308   : > { %p4967_p12 = pnand %p4975_p10, %p6669_p11 }
 0x30a   : > { %p4968_p13 = pneg %p4967_p12 }
 0x30c   : > { %5269 = dma.done.wait (%p4968_p13), %s3908_s11, 1024  }
 0x30d   : > { %5271 = vsyncadd (%p4968_p13), %s3908_s11, 4294966272  ;;  %s3917_s25 = scalar_lea.sflag [#allocation8], %s3907_s9 }
 0x30e   : > { %5273 = dma.done.wait (%p4968_p13), %s3917_s25, 256  }
 0x30f   : > { %5275 = vsyncadd (%p4968_p13), %s3917_s25, 4294967040  ;;  %p21_p5 = scmp.ge.s32.totalorder %s5362_s27, 4   ;;  %s6670_s21 = smov %s5282_s22 }
 0x310   : > { %s6671_s22 = smov %s5286_s23  ;;  %s6672_s23 = smov %s5373_s30 }
 0x311   : > { %s6673_s24 = smov %s5362_s27  ;;  %23 = sbr.rel (!%p21_p5) target bundleno = 6 (0x6), region = 115 }
 0x316   :  { %3922 = vsyncpa [#allocation4], 1 }
 0x317   :  { %3924 = vsyncpa [#allocation4 + $0x1], 1 }
 0x318   :  { %3925 = vsyncpa [#allocation5], 1 }
 0x319   :  { %3927 = vsyncpa [#allocation5 + $0x1], 1 }
 0x31a   :  { %3928 = vsyncpa [#allocation8], 1 }
 0x31b   :  { %3930 = vsyncpa [#allocation8 + $0x1], 1 }

</bundles_post_ra>
